<compile_context>
chip_gen: v7x
topology: tpu7x:2x2x1
jax: 0.10.0
libtpu: 0.0.40
codegen_flags: <defaults>
</compile_context>

<pallas_src>
import functools
import numpy as np
import jax
import jax.numpy as jnp
from jax.experimental import pallas as pl
from jax.experimental.pallas import tpu as pltpu


# ----------------------------- config ---------------------------------------
class Config:
    n_dec_vocab = 32
    n_dec_seq = 8
    d_hidn = 32
    n_head = 4
    d_head = 8
    d_ff = 64
    n_layer = 2
    i_pad = 0
    layer_norm_epsilon = 1e-6
    proj_drop = 0.0  # dropout is identity in eval mode


# --------------------- sinusoid positional table (host) ---------------------
def get_sinusoid_encoding_table(n_seq, d_hidn):
    def cal_angle(position, i_hidn):
        return position / np.power(10000, 2 * (i_hidn // 2) / d_hidn)

    table = np.array(
        [[cal_angle(p, i) for i in range(d_hidn)] for p in range(n_seq)],
        dtype=np.float64,
    )
    table[:, 0::2] = np.sin(table[:, 0::2])
    table[:, 1::2] = np.cos(table[:, 1::2])
    return table.astype(np.float32)


def _layer_norm(z, g, b, eps):
    mu = jnp.mean(z, axis=-1, keepdims=True)
    var = jnp.mean((z - mu) ** 2, axis=-1, keepdims=True)
    return (z - mu) * jax.lax.rsqrt(var + jnp.float32(eps)) * g + b


# ------------------------------ Pallas kernel --------------------------------
def fused_decoder_kernel(
    x_ref, bias_ref,
    wqkv_ref, bqkv_ref, wo_ref, bo_ref,
    g1_ref, be1_ref, w1_ref, b1_ref, w2_ref, b2_ref, g2_ref, be2_ref,
    y_ref, probs_ref,
    ctx_scratch,
    *, n_layer, batch, seq, n_head, d_head, eps,
):
    HD = n_head * d_head
    scale = jnp.float32(1.0 / np.sqrt(d_head))

    x = x_ref[...]  # (B*S, D) activations, flattened over batch

    for l in range(n_layer):  # static loop, weights stacked over layers in VMEM
        # ---- fused QKV projection over all B*S rows (one MXU dispatch) ----
        qkv = jnp.dot(x, wqkv_ref[l], preferred_element_type=jnp.float32) + bqkv_ref[l]
        q = qkv[:, 0 * HD:1 * HD]
        k = qkv[:, 1 * HD:2 * HD]
        v = qkv[:, 2 * HD:3 * HD]

        # ---- per-(batch, head) masked scaled-dot attention ----
        # context is written into a VMEM scratch slice-by-slice so the output
        # projection is a single (B*S, HD) @ (HD, D) matmul (no concatenate).
        for b in range(batch):
            r0 = b * seq
            mb = bias_ref[b]  # (S, S) additive mask bias (0 or -1e9)
            for h in range(n_head):
                c0 = h * d_head
                qh = q[r0:r0 + seq, c0:c0 + d_head]
                kh = k[r0:r0 + seq, c0:c0 + d_head]
                vh = v[r0:r0 + seq, c0:c0 + d_head]
                # q @ k^T without materializing a transpose
                s = jax.lax.dot_general(
                    qh, kh, (((1,), (1,)), ((), ())),
                    preferred_element_type=jnp.float32,
                ) * scale + mb
                s = s - jnp.max(s, axis=-1, keepdims=True)
                e = jnp.exp(s)
                # exact normalization: rows must sum to 1 (approx vrcp has
                # bf16-level error which broke the sum-to-one property).
                p = e / jnp.sum(e, axis=-1, keepdims=True)
                probs_ref[(l * batch + b) * n_head + h] = p
                ctx_scratch[r0:r0 + seq, c0:c0 + d_head] = jnp.dot(
                    p, vh, preferred_element_type=jnp.float32)

        attn_out = jnp.dot(ctx_scratch[...], wo_ref[l],
                           preferred_element_type=jnp.float32) + bo_ref[l]
        x1 = _layer_norm(x + attn_out, g1_ref[l], be1_ref[l], eps)

        # ---- position-wise FFN (Conv1d k=1 == per-token linear) ----
        # TODO(synk): PyTorch F.gelu default is the exact erf GELU; using the
        # tanh approximation (max abs diff ~1e-3) for guaranteed Mosaic lowering.
        h1 = jnp.dot(x1, w1_ref[l], preferred_element_type=jnp.float32) + b1_ref[l]
        h1 = jax.nn.gelu(h1, approximate=True)
        h2 = jnp.dot(h1, w2_ref[l], preferred_element_type=jnp.float32) + b2_ref[l]
        x = _layer_norm(x1 + h2, g2_ref[l], be2_ref[l], eps)

    y_ref[...] = x


# ------------------------------ parameter init -------------------------------
def init_params(cfg, key):
    D, H, Dh, F, L = cfg.d_hidn, cfg.n_head, cfg.d_head, cfg.d_ff, cfg.n_layer
    HD = H * Dh
    keys = jax.random.split(key, 1 + L)

    emb = jax.random.normal(keys[0], (cfg.n_dec_vocab, D), jnp.float32) * 0.02
    pos_table = jnp.asarray(get_sinusoid_encoding_table(cfg.n_dec_seq + 1, D))

    wqkv_l, wo_l, w1_l, w2_l = [], [], [], []
    for li in range(L):
        ks = jax.random.split(keys[1 + li], 6)
        scale = 0.02
        # weights stored pre-transposed: x @ W_t == x @ Linear.weight.T
        wq = jax.random.normal(ks[0], (D, HD), jnp.float32) * scale
        wk = jax.random.normal(ks[1], (D, HD), jnp.float32) * scale
        wv = jax.random.normal(ks[2], (D, HD), jnp.float32) * scale
        wqkv_l.append(jnp.concatenate([wq, wk, wv], axis=1))          # fused QKV
        wo_l.append(jax.random.normal(ks[3], (HD, D), jnp.float32) * scale)
        w1_l.append(jax.random.normal(ks[4], (D, F), jnp.float32) * scale)  # conv1 k=1
        w2_l.append(jax.random.normal(ks[5], (F, D), jnp.float32) * scale)  # conv2 k=1

    params = (
        jnp.stack(wqkv_l),                         # (L, D, 3*HD)
        jnp.zeros((L, 1, 3 * HD), jnp.float32),    # bqkv
        jnp.stack(wo_l),                           # (L, HD, D)
        jnp.zeros((L, 1, D), jnp.float32),         # bo
        jnp.ones((L, 1, D), jnp.float32),          # ln1 gamma
        jnp.zeros((L, 1, D), jnp.float32),         # ln1 beta
        jnp.stack(w1_l),                           # (L, D, F)
        jnp.zeros((L, 1, F), jnp.float32),         # b1
        jnp.stack(w2_l),                           # (L, F, D)
        jnp.zeros((L, 1, D), jnp.float32),         # b2
        jnp.ones((L, 1, D), jnp.float32),          # ln2 gamma
        jnp.zeros((L, 1, D), jnp.float32),         # ln2 beta
    )
    return emb, pos_table, params


# ----------------------- shared input preprocessing --------------------------
def _embed_and_mask(dec_inputs, emb, pos_table, cfg):
    B, S = dec_inputs.shape
    # positions = arange(S) + 1, zeroed where token == i_pad
    positions = jnp.broadcast_to(jnp.arange(1, S + 1, dtype=jnp.int32), (B, S))
    positions = jnp.where(dec_inputs == cfg.i_pad, 0, positions)
    x = jnp.take(emb, dec_inputs, axis=0) + jnp.take(pos_table, positions, axis=0)

    # additive attention-mask bias: pad (key is pad) OR causal (upper tri, k=1)
    pad_mask = (dec_inputs == cfg.i_pad)[:, None, :]                   # (B, 1, S)
    causal = jnp.triu(jnp.ones((S, S), jnp.bool_), k=1)[None, :, :]    # (1, S, S)
    masked = jnp.logical_or(pad_mask, causal)                          # (B, S, S)
    mask_bias = jnp.where(masked, -1e9, 0.0).astype(jnp.float32)
    return x, mask_bias


# ------------------------------ full decoder ---------------------------------
def decoder_forward(dec_inputs, emb, pos_table, params, cfg):
    B, S = dec_inputs.shape
    D, H, Dh, L = cfg.d_hidn, cfg.n_head, cfg.d_head, cfg.n_layer

    x, mask_bias = _embed_and_mask(dec_inputs, emb, pos_table, cfg)
    x = x.reshape(B * S, D)

    kernel = functools.partial(
        fused_decoder_kernel,
        n_layer=L, batch=B, seq=S, n_head=H, d_head=Dh,
        eps=cfg.layer_norm_epsilon,
    )

    # Single fused call: no grid, whole arrays resident in VMEM.
    y_flat, probs_flat = pl.pallas_call(
        kernel,
        out_shape=(
            jax.ShapeDtypeStruct((B * S, D), jnp.float32),
            jax.ShapeDtypeStruct((L * B * H, S, S), jnp.float32),
        ),
        scratch_shapes=[pltpu.VMEM((B * S, H * Dh), jnp.float32)],
    )(x, mask_bias, *params)

    y = y_flat.reshape(B, S, D)
    probs = probs_flat.reshape(L, B, H, S, S)
    return y, [probs[l] for l in range(L)]


# ------------------------------ pure-JAX reference ---------------------------
def decoder_reference(dec_inputs, emb, pos_table, params, cfg):
    B, S = dec_inputs.shape
    D, H, Dh, L = cfg.d_hidn, cfg.n_head, cfg.d_head, cfg.n_layer
    HD = H * Dh
    eps = cfg.layer_norm_epsilon

    x, mask_bias = _embed_and_mask(dec_inputs, emb, pos_table, cfg)
    (wqkv, bqkv, wo, bo, g1, be1, w1, b1, w2, b2, g2, be2) = params

    probs_all = []
    for l in range(L):
        qkv = x @ wqkv[l] + bqkv[l]                        # (B, S, 3*HD)
        q, k, v = jnp.split(qkv, 3, axis=-1)
        q = q.reshape(B, S, H, Dh).transpose(0, 2, 1, 3)
        k = k.reshape(B, S, H, Dh).transpose(0, 2, 1, 3)
        v = v.reshape(B, S, H, Dh).transpose(0, 2, 1, 3)
        s = jnp.einsum("bhqd,bhkd->bhqk", q, k) / np.sqrt(Dh) + mask_bias[:, None]
        p = jax.nn.softmax(s, axis=-1)
        probs_all.append(p)
        ctx = jnp.einsum("bhqk,bhkd->bhqd", p, v).transpose(0, 2, 1, 3).reshape(B, S, HD)
        attn = ctx @ wo[l] + bo[l]
        x1 = _layer_norm(x + attn, g1[l], be1[l], eps)
        hdn = jax.nn.gelu(x1 @ w1[l] + b1[l], approximate=True)
        x = _layer_norm(x1 + (hdn @ w2[l] + b2[l]), g2[l], be2[l], eps)
    return x, probs_all


# ------------------------------------ main ------------------------------------
if __name__ == "__main__":
    cfg = Config()
    key = jax.random.PRNGKey(0)
    pkey, tkey = jax.random.split(key)

    emb, pos_table, params = init_params(cfg, pkey)

    B, S = 2, cfg.n_dec_seq
    dec_inputs = jax.random.randint(tkey, (B, S), 1, cfg.n_dec_vocab, dtype=jnp.int32)
    dec_inputs = dec_inputs.at[1, -2:].set(cfg.i_pad)  # exercise pad masking

    out, attn_probs = decoder_forward(dec_inputs, emb, pos_table, params, cfg)
    out = jax.block_until_ready(out)
    for p in attn_probs:
        jax.block_until_ready(p)

    assert out.shape == (B, S, cfg.d_hidn)
    assert all(p.shape == (B, cfg.n_head, S, S) for p in attn_probs)
    assert bool(jnp.all(jnp.isfinite(out)))
    # attention rows should sum to ~1 (exact normalization in-kernel)
    for p in attn_probs:
        assert bool(jnp.all(jnp.abs(jnp.sum(p, axis=-1) - 1.0) < 1e-3))

    # compare against pure-JAX reference
    ref_out, ref_probs = decoder_reference(dec_inputs, emb, pos_table, params, cfg)
    assert bool(jnp.max(jnp.abs(out - ref_out)) < 2e-2)
    for p, rp in zip(attn_probs, ref_probs):
        assert bool(jnp.max(jnp.abs(p - rp)) < 1e-2)

    print("KERNEL_OK")
</pallas_src>

<mosaic_0001>
module attributes {stable_mosaic.version = 11 : i64} {
  func.func @fused_decoder_kernel(%arg0: memref<16x32xf32, #tpu.memory_space<vmem>>, %arg1: memref<2x8x8xf32, #tpu.memory_space<vmem>>, %arg2: memref<2x32x96xf32, #tpu.memory_space<vmem>>, %arg3: memref<2x1x96xf32, #tpu.memory_space<vmem>>, %arg4: memref<2x32x32xf32, #tpu.memory_space<vmem>>, %arg5: memref<2x1x32xf32, #tpu.memory_space<vmem>>, %arg6: memref<2x1x32xf32, #tpu.memory_space<vmem>>, %arg7: memref<2x1x32xf32, #tpu.memory_space<vmem>>, %arg8: memref<2x32x64xf32, #tpu.memory_space<vmem>>, %arg9: memref<2x1x64xf32, #tpu.memory_space<vmem>>, %arg10: memref<2x64x32xf32, #tpu.memory_space<vmem>>, %arg11: memref<2x1x32xf32, #tpu.memory_space<vmem>>, %arg12: memref<2x1x32xf32, #tpu.memory_space<vmem>>, %arg13: memref<2x1x32xf32, #tpu.memory_space<vmem>>, %arg14: memref<16x32xf32, #tpu.memory_space<vmem>>, %arg15: memref<16x8x8xf32, #tpu.memory_space<vmem>>, %arg16: memref<16x32xf32, #tpu.memory_space<vmem>>) attributes {dimension_semantics = [], scalar_prefetch = 0 : i64, scratch_operands = 1 : i64, tpu.core_type = #tpu.core_type<tc>} {
    %c0 = arith.constant 0 : index
    %c0_0 = arith.constant 0 : index
    %0 = vector.load %arg0[%c0, %c0_0] : memref<16x32xf32, #tpu.memory_space<vmem>>, vector<16x32xf32>
    %c0_1 = arith.constant 0 : index
    %c0_2 = arith.constant 0 : index
    %c0_3 = arith.constant 0 : index
    %1 = vector.load %arg2[%c0_1, %c0_2, %c0_3] : memref<2x32x96xf32, #tpu.memory_space<vmem>>, vector<1x32x96xf32>
    %2 = vector.shape_cast %1 : vector<1x32x96xf32> to vector<32x96xf32>
    %cst = arith.constant dense<0.000000e+00> : vector<16x96xf32>
    %3 = tpu.matmul %0, %2, %cst {dimension_numbers = #tpu.dot_dimension_numbers<[1], [0], [0], [1], [0, 0, 1, 1], [], []>} : vector<16x32xf32>, vector<32x96xf32>, vector<16x96xf32> -> vector<16x96xf32>
    %c0_4 = arith.constant 0 : index
    %c0_5 = arith.constant 0 : index
    %c0_6 = arith.constant 0 : index
    %4 = vector.load %arg3[%c0_4, %c0_5, %c0_6] : memref<2x1x96xf32, #tpu.memory_space<vmem>>, vector<1x1x96xf32>
    %5 = vector.shape_cast %4 : vector<1x1x96xf32> to vector<1x96xf32>
    %6 = vector.broadcast %5 : vector<1x96xf32> to vector<16x96xf32>
    %7 = arith.addf %3, %6 : vector<16x96xf32>
    %8 = vector.extract_strided_slice %7 {offsets = [0, 0], sizes = [16, 32], strides = [1, 1]} : vector<16x96xf32> to vector<16x32xf32>
    %9 = vector.extract_strided_slice %7 {offsets = [0, 32], sizes = [16, 32], strides = [1, 1]} : vector<16x96xf32> to vector<16x32xf32>
    %10 = vector.extract_strided_slice %7 {offsets = [0, 64], sizes = [16, 32], strides = [1, 1]} : vector<16x96xf32> to vector<16x32xf32>
    %c0_7 = arith.constant 0 : index
    %c0_8 = arith.constant 0 : index
    %c0_9 = arith.constant 0 : index
    %11 = vector.load %arg1[%c0_7, %c0_8, %c0_9] : memref<2x8x8xf32, #tpu.memory_space<vmem>>, vector<1x8x8xf32>
    %12 = vector.shape_cast %11 : vector<1x8x8xf32> to vector<8x8xf32>
    %13 = vector.extract_strided_slice %8 {offsets = [0, 0], sizes = [8, 8], strides = [1, 1]} : vector<16x32xf32> to vector<8x8xf32>
    %14 = vector.extract_strided_slice %9 {offsets = [0, 0], sizes = [8, 8], strides = [1, 1]} : vector<16x32xf32> to vector<8x8xf32>
    %15 = vector.extract_strided_slice %10 {offsets = [0, 0], sizes = [8, 8], strides = [1, 1]} : vector<16x32xf32> to vector<8x8xf32>
    %cst_10 = arith.constant dense<0.000000e+00> : vector<8x8xf32>
    %16 = tpu.matmul %13, %14, %cst_10 {dimension_numbers = #tpu.dot_dimension_numbers<[1], [1], [0], [0], [0, 0, 1, 0], [], []>} : vector<8x8xf32>, vector<8x8xf32>, vector<8x8xf32> -> vector<8x8xf32>
    %cst_11 = arith.constant 0.353553385 : f32
    %17 = vector.broadcast %cst_11 : f32 to vector<8x8xf32>
    %18 = arith.mulf %16, %17 : vector<8x8xf32>
    %19 = arith.addf %18, %12 : vector<8x8xf32>
    %cst_12 = arith.constant dense<0xFF800000> : vector<8xf32>
    %20 = vector.multi_reduction <maximumf>, %19, %cst_12 [1] : vector<8x8xf32> to vector<8xf32>
    %21 = vector.shape_cast %20 : vector<8xf32> to vector<8x1xf32>
    %22 = vector.broadcast %21 : vector<8x1xf32> to vector<8x8xf32>
    %23 = arith.subf %19, %22 : vector<8x8xf32>
    %24 = math.exp %23 : vector<8x8xf32>
    %cst_13 = arith.constant dense<0.000000e+00> : vector<8xf32>
    %25 = vector.multi_reduction <add>, %24, %cst_13 [1] : vector<8x8xf32> to vector<8xf32>
    %26 = vector.shape_cast %25 : vector<8xf32> to vector<8x1xf32>
    %27 = vector.broadcast %26 : vector<8x1xf32> to vector<8x8xf32>
    %28 = arith.divf %24, %27 : vector<8x8xf32>
    %c0_14 = arith.constant 0 : index
    %c0_15 = arith.constant 0 : index
    %c0_16 = arith.constant 0 : index
    %29 = vector.load %arg15[%c0_14, %c0_15, %c0_16] : memref<16x8x8xf32, #tpu.memory_space<vmem>>, vector<1x8x8xf32>
    %30 = vector.shape_cast %29 : vector<1x8x8xf32> to vector<8x8xf32>
    %31 = vector.shape_cast %28 : vector<8x8xf32> to vector<1x8x8xf32>
    tpu.vector_store %arg15[%c0_14, %c0_15, %c0_16], %31 {strides = array<i32>} : memref<16x8x8xf32, #tpu.memory_space<vmem>>, vector<1x8x8xf32>,
    %cst_17 = arith.constant dense<0.000000e+00> : vector<8x8xf32>
    %32 = tpu.matmul %28, %15, %cst_17 {dimension_numbers = #tpu.dot_dimension_numbers<[1], [0], [0], [1], [0, 0, 1, 1], [], []>} : vector<8x8xf32>, vector<8x8xf32>, vector<8x8xf32> -> vector<8x8xf32>
    %c0_18 = arith.constant 0 : index
    %c0_19 = arith.constant 0 : index
    %33 = vector.load %arg16[%c0_18, %c0_19] : memref<16x32xf32, #tpu.memory_space<vmem>>, vector<8x8xf32>
    tpu.vector_store %arg16[%c0_18, %c0_19], %32 {strides = array<i32>} : memref<16x32xf32, #tpu.memory_space<vmem>>, vector<8x8xf32>,
    %34 = vector.extract_strided_slice %8 {offsets = [0, 8], sizes = [8, 8], strides = [1, 1]} : vector<16x32xf32> to vector<8x8xf32>
    %35 = vector.extract_strided_slice %9 {offsets = [0, 8], sizes = [8, 8], strides = [1, 1]} : vector<16x32xf32> to vector<8x8xf32>
    %36 = vector.extract_strided_slice %10 {offsets = [0, 8], sizes = [8, 8], strides = [1, 1]} : vector<16x32xf32> to vector<8x8xf32>
    %cst_20 = arith.constant dense<0.000000e+00> : vector<8x8xf32>
    %37 = tpu.matmul %34, %35, %cst_20 {dimension_numbers = #tpu.dot_dimension_numbers<[1], [1], [0], [0], [0, 0, 1, 0], [], []>} : vector<8x8xf32>, vector<8x8xf32>, vector<8x8xf32> -> vector<8x8xf32>
    %cst_21 = arith.constant 0.353553385 : f32
    %38 = vector.broadcast %cst_21 : f32 to vector<8x8xf32>
    %39 = arith.mulf %37, %38 : vector<8x8xf32>
    %40 = arith.addf %39, %12 : vector<8x8xf32>
    %cst_22 = arith.constant dense<0xFF800000> : vector<8xf32>
    %41 = vector.multi_reduction <maximumf>, %40, %cst_22 [1] : vector<8x8xf32> to vector<8xf32>
    %42 = vector.shape_cast %41 : vector<8xf32> to vector<8x1xf32>
    %43 = vector.broadcast %42 : vector<8x1xf32> to vector<8x8xf32>
    %44 = arith.subf %40, %43 : vector<8x8xf32>
    %45 = math.exp %44 : vector<8x8xf32>
    %cst_23 = arith.constant dense<0.000000e+00> : vector<8xf32>
    %46 = vector.multi_reduction <add>, %45, %cst_23 [1] : vector<8x8xf32> to vector<8xf32>
    %47 = vector.shape_cast %46 : vector<8xf32> to vector<8x1xf32>
    %48 = vector.broadcast %47 : vector<8x1xf32> to vector<8x8xf32>
    %49 = arith.divf %45, %48 : vector<8x8xf32>
    %c1 = arith.constant 1 : index
    %c0_24 = arith.constant 0 : index
    %c0_25 = arith.constant 0 : index
    %50 = vector.load %arg15[%c1, %c0_24, %c0_25] : memref<16x8x8xf32, #tpu.memory_space<vmem>>, vector<1x8x8xf32>
    %51 = vector.shape_cast %50 : vector<1x8x8xf32> to vector<8x8xf32>
    %52 = vector.shape_cast %49 : vector<8x8xf32> to vector<1x8x8xf32>
    tpu.vector_store %arg15[%c1, %c0_24, %c0_25], %52 {strides = array<i32>} : memref<16x8x8xf32, #tpu.memory_space<vmem>>, vector<1x8x8xf32>,
    %cst_26 = arith.constant dense<0.000000e+00> : vector<8x8xf32>
    %53 = tpu.matmul %49, %36, %cst_26 {dimension_numbers = #tpu.dot_dimension_numbers<[1], [0], [0], [1], [0, 0, 1, 1], [], []>} : vector<8x8xf32>, vector<8x8xf32>, vector<8x8xf32> -> vector<8x8xf32>
    %c0_27 = arith.constant 0 : index
    %c8 = arith.constant 8 : index
    %54 = vector.load %arg16[%c0_27, %c8] : memref<16x32xf32, #tpu.memory_space<vmem>>, vector<8x8xf32>
    tpu.vector_store %arg16[%c0_27, %c8], %53 {strides = array<i32>} : memref<16x32xf32, #tpu.memory_space<vmem>>, vector<8x8xf32>,
    %55 = vector.extract_strided_slice %8 {offsets = [0, 16], sizes = [8, 8], strides = [1, 1]} : vector<16x32xf32> to vector<8x8xf32>
    %56 = vector.extract_strided_slice %9 {offsets = [0, 16], sizes = [8, 8], strides = [1, 1]} : vector<16x32xf32> to vector<8x8xf32>
    %57 = vector.extract_strided_slice %10 {offsets = [0, 16], sizes = [8, 8], strides = [1, 1]} : vector<16x32xf32> to vector<8x8xf32>
    %cst_28 = arith.constant dense<0.000000e+00> : vector<8x8xf32>
    %58 = tpu.matmul %55, %56, %cst_28 {dimension_numbers = #tpu.dot_dimension_numbers<[1], [1], [0], [0], [0, 0, 1, 0], [], []>} : vector<8x8xf32>, vector<8x8xf32>, vector<8x8xf32> -> vector<8x8xf32>
    %cst_29 = arith.constant 0.353553385 : f32
    %59 = vector.broadcast %cst_29 : f32 to vector<8x8xf32>
    %60 = arith.mulf %58, %59 : vector<8x8xf32>
    %61 = arith.addf %60, %12 : vector<8x8xf32>
    %cst_30 = arith.constant dense<0xFF800000> : vector<8xf32>
    %62 = vector.multi_reduction <maximumf>, %61, %cst_30 [1] : vector<8x8xf32> to vector<8xf32>
    %63 = vector.shape_cast %62 : vector<8xf32> to vector<8x1xf32>
    %64 = vector.broadcast %63 : vector<8x1xf32> to vector<8x8xf32>
    %65 = arith.subf %61, %64 : vector<8x8xf32>
    %66 = math.exp %65 : vector<8x8xf32>
    %cst_31 = arith.constant dense<0.000000e+00> : vector<8xf32>
    %67 = vector.multi_reduction <add>, %66, %cst_31 [1] : vector<8x8xf32> to vector<8xf32>
    %68 = vector.shape_cast %67 : vector<8xf32> to vector<8x1xf32>
    %69 = vector.broadcast %68 : vector<8x1xf32> to vector<8x8xf32>
    %70 = arith.divf %66, %69 : vector<8x8xf32>
    %c2 = arith.constant 2 : index
    %c0_32 = arith.constant 0 : index
    %c0_33 = arith.constant 0 : index
    %71 = vector.load %arg15[%c2, %c0_32, %c0_33] : memref<16x8x8xf32, #tpu.memory_space<vmem>>, vector<1x8x8xf32>
    %72 = vector.shape_cast %71 : vector<1x8x8xf32> to vector<8x8xf32>
    %73 = vector.shape_cast %70 : vector<8x8xf32> to vector<1x8x8xf32>
    tpu.vector_store %arg15[%c2, %c0_32, %c0_33], %73 {strides = array<i32>} : memref<16x8x8xf32, #tpu.memory_space<vmem>>, vector<1x8x8xf32>,
    %cst_34 = arith.constant dense<0.000000e+00> : vector<8x8xf32>
    %74 = tpu.matmul %70, %57, %cst_34 {dimension_numbers = #tpu.dot_dimension_numbers<[1], [0], [0], [1], [0, 0, 1, 1], [], []>} : vector<8x8xf32>, vector<8x8xf32>, vector<8x8xf32> -> vector<8x8xf32>
    %c0_35 = arith.constant 0 : index
    %c16 = arith.constant 16 : index
    %75 = vector.load %arg16[%c0_35, %c16] : memref<16x32xf32, #tpu.memory_space<vmem>>, vector<8x8xf32>
    tpu.vector_store %arg16[%c0_35, %c16], %74 {strides = array<i32>} : memref<16x32xf32, #tpu.memory_space<vmem>>, vector<8x8xf32>,
    %76 = vector.extract_strided_slice %8 {offsets = [0, 24], sizes = [8, 8], strides = [1, 1]} : vector<16x32xf32> to vector<8x8xf32>
    %77 = vector.extract_strided_slice %9 {offsets = [0, 24], sizes = [8, 8], strides = [1, 1]} : vector<16x32xf32> to vector<8x8xf32>
    %78 = vector.extract_strided_slice %10 {offsets = [0, 24], sizes = [8, 8], strides = [1, 1]} : vector<16x32xf32> to vector<8x8xf32>
    %cst_36 = arith.constant dense<0.000000e+00> : vector<8x8xf32>
    %79 = tpu.matmul %76, %77, %cst_36 {dimension_numbers = #tpu.dot_dimension_numbers<[1], [1], [0], [0], [0, 0, 1, 0], [], []>} : vector<8x8xf32>, vector<8x8xf32>, vector<8x8xf32> -> vector<8x8xf32>
    %cst_37 = arith.constant 0.353553385 : f32
    %80 = vector.broadcast %cst_37 : f32 to vector<8x8xf32>
    %81 = arith.mulf %79, %80 : vector<8x8xf32>
    %82 = arith.addf %81, %12 : vector<8x8xf32>
    %cst_38 = arith.constant dense<0xFF800000> : vector<8xf32>
    %83 = vector.multi_reduction <maximumf>, %82, %cst_38 [1] : vector<8x8xf32> to vector<8xf32>
    %84 = vector.shape_cast %83 : vector<8xf32> to vector<8x1xf32>
    %85 = vector.broadcast %84 : vector<8x1xf32> to vector<8x8xf32>
    %86 = arith.subf %82, %85 : vector<8x8xf32>
    %87 = math.exp %86 : vector<8x8xf32>
    %cst_39 = arith.constant dense<0.000000e+00> : vector<8xf32>
    %88 = vector.multi_reduction <add>, %87, %cst_39 [1] : vector<8x8xf32> to vector<8xf32>
    %89 = vector.shape_cast %88 : vector<8xf32> to vector<8x1xf32>
    %90 = vector.broadcast %89 : vector<8x1xf32> to vector<8x8xf32>
    %91 = arith.divf %87, %90 : vector<8x8xf32>
    %c3 = arith.constant 3 : index
    %c0_40 = arith.constant 0 : index
    %c0_41 = arith.constant 0 : index
    %92 = vector.load %arg15[%c3, %c0_40, %c0_41] : memref<16x8x8xf32, #tpu.memory_space<vmem>>, vector<1x8x8xf32>
    %93 = vector.shape_cast %92 : vector<1x8x8xf32> to vector<8x8xf32>
    %94 = vector.shape_cast %91 : vector<8x8xf32> to vector<1x8x8xf32>
    tpu.vector_store %arg15[%c3, %c0_40, %c0_41], %94 {strides = array<i32>} : memref<16x8x8xf32, #tpu.memory_space<vmem>>, vector<1x8x8xf32>,
    %cst_42 = arith.constant dense<0.000000e+00> : vector<8x8xf32>
    %95 = tpu.matmul %91, %78, %cst_42 {dimension_numbers = #tpu.dot_dimension_numbers<[1], [0], [0], [1], [0, 0, 1, 1], [], []>} : vector<8x8xf32>, vector<8x8xf32>, vector<8x8xf32> -> vector<8x8xf32>
    %c0_43 = arith.constant 0 : index
    %c24 = arith.constant 24 : index
    %96 = vector.load %arg16[%c0_43, %c24] : memref<16x32xf32, #tpu.memory_space<vmem>>, vector<8x8xf32>
    tpu.vector_store %arg16[%c0_43, %c24], %95 {strides = array<i32>} : memref<16x32xf32, #tpu.memory_space<vmem>>, vector<8x8xf32>,
    %c1_44 = arith.constant 1 : index
    %c0_45 = arith.constant 0 : index
    %c0_46 = arith.constant 0 : index
    %97 = vector.load %arg1[%c1_44, %c0_45, %c0_46] : memref<2x8x8xf32, #tpu.memory_space<vmem>>, vector<1x8x8xf32>
    %98 = vector.shape_cast %97 : vector<1x8x8xf32> to vector<8x8xf32>
    %99 = vector.extract_strided_slice %8 {offsets = [8, 0], sizes = [8, 8], strides = [1, 1]} : vector<16x32xf32> to vector<8x8xf32>
    %100 = vector.extract_strided_slice %9 {offsets = [8, 0], sizes = [8, 8], strides = [1, 1]} : vector<16x32xf32> to vector<8x8xf32>
    %101 = vector.extract_strided_slice %10 {offsets = [8, 0], sizes = [8, 8], strides = [1, 1]} : vector<16x32xf32> to vector<8x8xf32>
    %cst_47 = arith.constant dense<0.000000e+00> : vector<8x8xf32>
    %102 = tpu.matmul %99, %100, %cst_47 {dimension_numbers = #tpu.dot_dimension_numbers<[1], [1], [0], [0], [0, 0, 1, 0], [], []>} : vector<8x8xf32>, vector<8x8xf32>, vector<8x8xf32> -> vector<8x8xf32>
    %cst_48 = arith.constant 0.353553385 : f32
    %103 = vector.broadcast %cst_48 : f32 to vector<8x8xf32>
    %104 = arith.mulf %102, %103 : vector<8x8xf32>
    %105 = arith.addf %104, %98 : vector<8x8xf32>
    %cst_49 = arith.constant dense<0xFF800000> : vector<8xf32>
    %106 = vector.multi_reduction <maximumf>, %105, %cst_49 [1] : vector<8x8xf32> to vector<8xf32>
    %107 = vector.shape_cast %106 : vector<8xf32> to vector<8x1xf32>
    %108 = vector.broadcast %107 : vector<8x1xf32> to vector<8x8xf32>
    %109 = arith.subf %105, %108 : vector<8x8xf32>
    %110 = math.exp %109 : vector<8x8xf32>
    %cst_50 = arith.constant dense<0.000000e+00> : vector<8xf32>
    %111 = vector.multi_reduction <add>, %110, %cst_50 [1] : vector<8x8xf32> to vector<8xf32>
    %112 = vector.shape_cast %111 : vector<8xf32> to vector<8x1xf32>
    %113 = vector.broadcast %112 : vector<8x1xf32> to vector<8x8xf32>
    %114 = arith.divf %110, %113 : vector<8x8xf32>
    %c4 = arith.constant 4 : index
    %c0_51 = arith.constant 0 : index
    %c0_52 = arith.constant 0 : index
    %115 = vector.load %arg15[%c4, %c0_51, %c0_52] : memref<16x8x8xf32, #tpu.memory_space<vmem>>, vector<1x8x8xf32>
    %116 = vector.shape_cast %115 : vector<1x8x8xf32> to vector<8x8xf32>
    %117 = vector.shape_cast %114 : vector<8x8xf32> to vector<1x8x8xf32>
    tpu.vector_store %arg15[%c4, %c0_51, %c0_52], %117 {strides = array<i32>} : memref<16x8x8xf32, #tpu.memory_space<vmem>>, vector<1x8x8xf32>,
    %cst_53 = arith.constant dense<0.000000e+00> : vector<8x8xf32>
    %118 = tpu.matmul %114, %101, %cst_53 {dimension_numbers = #tpu.dot_dimension_numbers<[1], [0], [0], [1], [0, 0, 1, 1], [], []>} : vector<8x8xf32>, vector<8x8xf32>, vector<8x8xf32> -> vector<8x8xf32>
    %c8_54 = arith.constant 8 : index
    %c0_55 = arith.constant 0 : index
    %119 = vector.load %arg16[%c8_54, %c0_55] : memref<16x32xf32, #tpu.memory_space<vmem>>, vector<8x8xf32>
    tpu.vector_store %arg16[%c8_54, %c0_55], %118 {strides = array<i32>} : memref<16x32xf32, #tpu.memory_space<vmem>>, vector<8x8xf32>,
    %120 = vector.extract_strided_slice %8 {offsets = [8, 8], sizes = [8, 8], strides = [1, 1]} : vector<16x32xf32> to vector<8x8xf32>
    %121 = vector.extract_strided_slice %9 {offsets = [8, 8], sizes = [8, 8], strides = [1, 1]} : vector<16x32xf32> to vector<8x8xf32>
    %122 = vector.extract_strided_slice %10 {offsets = [8, 8], sizes = [8, 8], strides = [1, 1]} : vector<16x32xf32> to vector<8x8xf32>
    %cst_56 = arith.constant dense<0.000000e+00> : vector<8x8xf32>
    %123 = tpu.matmul %120, %121, %cst_56 {dimension_numbers = #tpu.dot_dimension_numbers<[1], [1], [0], [0], [0, 0, 1, 0], [], []>} : vector<8x8xf32>, vector<8x8xf32>, vector<8x8xf32> -> vector<8x8xf32>
    %cst_57 = arith.constant 0.353553385 : f32
    %124 = vector.broadcast %cst_57 : f32 to vector<8x8xf32>
    %125 = arith.mulf %123, %124 : vector<8x8xf32>
    %126 = arith.addf %125, %98 : vector<8x8xf32>
    %cst_58 = arith.constant dense<0xFF800000> : vector<8xf32>
    %127 = vector.multi_reduction <maximumf>, %126, %cst_58 [1] : vector<8x8xf32> to vector<8xf32>
    %128 = vector.shape_cast %127 : vector<8xf32> to vector<8x1xf32>
    %129 = vector.broadcast %128 : vector<8x1xf32> to vector<8x8xf32>
    %130 = arith.subf %126, %129 : vector<8x8xf32>
    %131 = math.exp %130 : vector<8x8xf32>
    %cst_59 = arith.constant dense<0.000000e+00> : vector<8xf32>
    %132 = vector.multi_reduction <add>, %131, %cst_59 [1] : vector<8x8xf32> to vector<8xf32>
    %133 = vector.shape_cast %132 : vector<8xf32> to vector<8x1xf32>
    %134 = vector.broadcast %133 : vector<8x1xf32> to vector<8x8xf32>
    %135 = arith.divf %131, %134 : vector<8x8xf32>
    %c5 = arith.constant 5 : index
    %c0_60 = arith.constant 0 : index
    %c0_61 = arith.constant 0 : index
    %136 = vector.load %arg15[%c5, %c0_60, %c0_61] : memref<16x8x8xf32, #tpu.memory_space<vmem>>, vector<1x8x8xf32>
    %137 = vector.shape_cast %136 : vector<1x8x8xf32> to vector<8x8xf32>
    %138 = vector.shape_cast %135 : vector<8x8xf32> to vector<1x8x8xf32>
    tpu.vector_store %arg15[%c5, %c0_60, %c0_61], %138 {strides = array<i32>} : memref<16x8x8xf32, #tpu.memory_space<vmem>>, vector<1x8x8xf32>,
    %cst_62 = arith.constant dense<0.000000e+00> : vector<8x8xf32>
    %139 = tpu.matmul %135, %122, %cst_62 {dimension_numbers = #tpu.dot_dimension_numbers<[1], [0], [0], [1], [0, 0, 1, 1], [], []>} : vector<8x8xf32>, vector<8x8xf32>, vector<8x8xf32> -> vector<8x8xf32>
    %c8_63 = arith.constant 8 : index
    %c8_64 = arith.constant 8 : index
    %140 = vector.load %arg16[%c8_63, %c8_64] : memref<16x32xf32, #tpu.memory_space<vmem>>, vector<8x8xf32>
    tpu.vector_store %arg16[%c8_63, %c8_64], %139 {strides = array<i32>} : memref<16x32xf32, #tpu.memory_space<vmem>>, vector<8x8xf32>,
    %141 = vector.extract_strided_slice %8 {offsets = [8, 16], sizes = [8, 8], strides = [1, 1]} : vector<16x32xf32> to vector<8x8xf32>
    %142 = vector.extract_strided_slice %9 {offsets = [8, 16], sizes = [8, 8], strides = [1, 1]} : vector<16x32xf32> to vector<8x8xf32>
    %143 = vector.extract_strided_slice %10 {offsets = [8, 16], sizes = [8, 8], strides = [1, 1]} : vector<16x32xf32> to vector<8x8xf32>
    %cst_65 = arith.constant dense<0.000000e+00> : vector<8x8xf32>
    %144 = tpu.matmul %141, %142, %cst_65 {dimension_numbers = #tpu.dot_dimension_numbers<[1], [1], [0], [0], [0, 0, 1, 0], [], []>} : vector<8x8xf32>, vector<8x8xf32>, vector<8x8xf32> -> vector<8x8xf32>
    %cst_66 = arith.constant 0.353553385 : f32
    %145 = vector.broadcast %cst_66 : f32 to vector<8x8xf32>
    %146 = arith.mulf %144, %145 : vector<8x8xf32>
    %147 = arith.addf %146, %98 : vector<8x8xf32>
    %cst_67 = arith.constant dense<0xFF800000> : vector<8xf32>
    %148 = vector.multi_reduction <maximumf>, %147, %cst_67 [1] : vector<8x8xf32> to vector<8xf32>
    %149 = vector.shape_cast %148 : vector<8xf32> to vector<8x1xf32>
    %150 = vector.broadcast %149 : vector<8x1xf32> to vector<8x8xf32>
    %151 = arith.subf %147, %150 : vector<8x8xf32>
    %152 = math.exp %151 : vector<8x8xf32>
    %cst_68 = arith.constant dense<0.000000e+00> : vector<8xf32>
    %153 = vector.multi_reduction <add>, %152, %cst_68 [1] : vector<8x8xf32> to vector<8xf32>
    %154 = vector.shape_cast %153 : vector<8xf32> to vector<8x1xf32>
    %155 = vector.broadcast %154 : vector<8x1xf32> to vector<8x8xf32>
    %156 = arith.divf %152, %155 : vector<8x8xf32>
    %c6 = arith.constant 6 : index
    %c0_69 = arith.constant 0 : index
    %c0_70 = arith.constant 0 : index
    %157 = vector.load %arg15[%c6, %c0_69, %c0_70] : memref<16x8x8xf32, #tpu.memory_space<vmem>>, vector<1x8x8xf32>
    %158 = vector.shape_cast %157 : vector<1x8x8xf32> to vector<8x8xf32>
    %159 = vector.shape_cast %156 : vector<8x8xf32> to vector<1x8x8xf32>
    tpu.vector_store %arg15[%c6, %c0_69, %c0_70], %159 {strides = array<i32>} : memref<16x8x8xf32, #tpu.memory_space<vmem>>, vector<1x8x8xf32>,
    %cst_71 = arith.constant dense<0.000000e+00> : vector<8x8xf32>
    %160 = tpu.matmul %156, %143, %cst_71 {dimension_numbers = #tpu.dot_dimension_numbers<[1], [0], [0], [1], [0, 0, 1, 1], [], []>} : vector<8x8xf32>, vector<8x8xf32>, vector<8x8xf32> -> vector<8x8xf32>
    %c8_72 = arith.constant 8 : index
    %c16_73 = arith.constant 16 : index
    %161 = vector.load %arg16[%c8_72, %c16_73] : memref<16x32xf32, #tpu.memory_space<vmem>>, vector<8x8xf32>
    tpu.vector_store %arg16[%c8_72, %c16_73], %160 {strides = array<i32>} : memref<16x32xf32, #tpu.memory_space<vmem>>, vector<8x8xf32>,
    %162 = vector.extract_strided_slice %8 {offsets = [8, 24], sizes = [8, 8], strides = [1, 1]} : vector<16x32xf32> to vector<8x8xf32>
    %163 = vector.extract_strided_slice %9 {offsets = [8, 24], sizes = [8, 8], strides = [1, 1]} : vector<16x32xf32> to vector<8x8xf32>
    %164 = vector.extract_strided_slice %10 {offsets = [8, 24], sizes = [8, 8], strides = [1, 1]} : vector<16x32xf32> to vector<8x8xf32>
    %cst_74 = arith.constant dense<0.000000e+00> : vector<8x8xf32>
    %165 = tpu.matmul %162, %163, %cst_74 {dimension_numbers = #tpu.dot_dimension_numbers<[1], [1], [0], [0], [0, 0, 1, 0], [], []>} : vector<8x8xf32>, vector<8x8xf32>, vector<8x8xf32> -> vector<8x8xf32>
    %cst_75 = arith.constant 0.353553385 : f32
    %166 = vector.broadcast %cst_75 : f32 to vector<8x8xf32>
    %167 = arith.mulf %165, %166 : vector<8x8xf32>
    %168 = arith.addf %167, %98 : vector<8x8xf32>
    %cst_76 = arith.constant dense<0xFF800000> : vector<8xf32>
    %169 = vector.multi_reduction <maximumf>, %168, %cst_76 [1] : vector<8x8xf32> to vector<8xf32>
    %170 = vector.shape_cast %169 : vector<8xf32> to vector<8x1xf32>
    %171 = vector.broadcast %170 : vector<8x1xf32> to vector<8x8xf32>
    %172 = arith.subf %168, %171 : vector<8x8xf32>
    %173 = math.exp %172 : vector<8x8xf32>
    %cst_77 = arith.constant dense<0.000000e+00> : vector<8xf32>
    %174 = vector.multi_reduction <add>, %173, %cst_77 [1] : vector<8x8xf32> to vector<8xf32>
    %175 = vector.shape_cast %174 : vector<8xf32> to vector<8x1xf32>
    %176 = vector.broadcast %175 : vector<8x1xf32> to vector<8x8xf32>
    %177 = arith.divf %173, %176 : vector<8x8xf32>
    %c7 = arith.constant 7 : index
    %c0_78 = arith.constant 0 : index
    %c0_79 = arith.constant 0 : index
    %178 = vector.load %arg15[%c7, %c0_78, %c0_79] : memref<16x8x8xf32, #tpu.memory_space<vmem>>, vector<1x8x8xf32>
    %179 = vector.shape_cast %178 : vector<1x8x8xf32> to vector<8x8xf32>
    %180 = vector.shape_cast %177 : vector<8x8xf32> to vector<1x8x8xf32>
    tpu.vector_store %arg15[%c7, %c0_78, %c0_79], %180 {strides = array<i32>} : memref<16x8x8xf32, #tpu.memory_space<vmem>>, vector<1x8x8xf32>,
    %cst_80 = arith.constant dense<0.000000e+00> : vector<8x8xf32>
    %181 = tpu.matmul %177, %164, %cst_80 {dimension_numbers = #tpu.dot_dimension_numbers<[1], [0], [0], [1], [0, 0, 1, 1], [], []>} : vector<8x8xf32>, vector<8x8xf32>, vector<8x8xf32> -> vector<8x8xf32>
    %c8_81 = arith.constant 8 : index
    %c24_82 = arith.constant 24 : index
    %182 = vector.load %arg16[%c8_81, %c24_82] : memref<16x32xf32, #tpu.memory_space<vmem>>, vector<8x8xf32>
    tpu.vector_store %arg16[%c8_81, %c24_82], %181 {strides = array<i32>} : memref<16x32xf32, #tpu.memory_space<vmem>>, vector<8x8xf32>,
    %c0_83 = arith.constant 0 : index
    %c0_84 = arith.constant 0 : index
    %183 = vector.load %arg16[%c0_83, %c0_84] : memref<16x32xf32, #tpu.memory_space<vmem>>, vector<16x32xf32>
    %c0_85 = arith.constant 0 : index
    %c0_86 = arith.constant 0 : index
    %c0_87 = arith.constant 0 : index
    %184 = vector.load %arg4[%c0_85, %c0_86, %c0_87] : memref<2x32x32xf32, #tpu.memory_space<vmem>>, vector<1x32x32xf32>
    %185 = vector.shape_cast %184 : vector<1x32x32xf32> to vector<32x32xf32>
    %cst_88 = arith.constant dense<0.000000e+00> : vector<16x32xf32>
    %186 = tpu.matmul %183, %185, %cst_88 {dimension_numbers = #tpu.dot_dimension_numbers<[1], [0], [0], [1], [0, 0, 1, 1], [], []>} : vector<16x32xf32>, vector<32x32xf32>, vector<16x32xf32> -> vector<16x32xf32>
    %c0_89 = arith.constant 0 : index
    %c0_90 = arith.constant 0 : index
    %c0_91 = arith.constant 0 : index
    %187 = vector.load %arg5[%c0_89, %c0_90, %c0_91] : memref<2x1x32xf32, #tpu.memory_space<vmem>>, vector<1x1x32xf32>
    %188 = vector.shape_cast %187 : vector<1x1x32xf32> to vector<1x32xf32>
    %189 = vector.broadcast %188 : vector<1x32xf32> to vector<16x32xf32>
    %190 = arith.addf %186, %189 : vector<16x32xf32>
    %191 = arith.addf %0, %190 : vector<16x32xf32>
    %c0_92 = arith.constant 0 : index
    %c0_93 = arith.constant 0 : index
    %c0_94 = arith.constant 0 : index
    %192 = vector.load %arg6[%c0_92, %c0_93, %c0_94] : memref<2x1x32xf32, #tpu.memory_space<vmem>>, vector<1x1x32xf32>
    %193 = vector.shape_cast %192 : vector<1x1x32xf32> to vector<1x32xf32>
    %c0_95 = arith.constant 0 : index
    %c0_96 = arith.constant 0 : index
    %c0_97 = arith.constant 0 : index
    %194 = vector.load %arg7[%c0_95, %c0_96, %c0_97] : memref<2x1x32xf32, #tpu.memory_space<vmem>>, vector<1x1x32xf32>
    %195 = vector.shape_cast %194 : vector<1x1x32xf32> to vector<1x32xf32>
    %cst_98 = arith.constant dense<0.000000e+00> : vector<16xf32>
    %196 = vector.multi_reduction <add>, %191, %cst_98 [1] : vector<16x32xf32> to vector<16xf32>
    %197 = vector.shape_cast %196 : vector<16xf32> to vector<16x1xf32>
    %cst_99 = arith.constant 3.200000e+01 : f32
    %198 = vector.broadcast %cst_99 : f32 to vector<16x1xf32>
    %199 = arith.divf %197, %198 : vector<16x1xf32>
    %200 = vector.broadcast %199 : vector<16x1xf32> to vector<16x32xf32>
    %201 = arith.subf %191, %200 : vector<16x32xf32>
    %202 = arith.mulf %201, %201 : vector<16x32xf32>
    %cst_100 = arith.constant dense<0.000000e+00> : vector<16xf32>
    %203 = vector.multi_reduction <add>, %202, %cst_100 [1] : vector<16x32xf32> to vector<16xf32>
    %204 = vector.shape_cast %203 : vector<16xf32> to vector<16x1xf32>
    %cst_101 = arith.constant 3.200000e+01 : f32
    %205 = vector.broadcast %cst_101 : f32 to vector<16x1xf32>
    %206 = arith.divf %204, %205 : vector<16x1xf32>
    %207 = vector.broadcast %199 : vector<16x1xf32> to vector<16x32xf32>
    %208 = arith.subf %191, %207 : vector<16x32xf32>
    %cst_102 = arith.constant 9.99999997E-7 : f32
    %209 = vector.broadcast %cst_102 : f32 to vector<16x1xf32>
    %210 = arith.addf %206, %209 : vector<16x1xf32>
    %211 = math.rsqrt %210 : vector<16x1xf32>
    %212 = vector.broadcast %211 : vector<16x1xf32> to vector<16x32xf32>
    %213 = arith.mulf %208, %212 : vector<16x32xf32>
    %214 = vector.broadcast %193 : vector<1x32xf32> to vector<16x32xf32>
    %215 = arith.mulf %213, %214 : vector<16x32xf32>
    %216 = vector.broadcast %195 : vector<1x32xf32> to vector<16x32xf32>
    %217 = arith.addf %215, %216 : vector<16x32xf32>
    %c0_103 = arith.constant 0 : index
    %c0_104 = arith.constant 0 : index
    %c0_105 = arith.constant 0 : index
    %218 = vector.load %arg8[%c0_103, %c0_104, %c0_105] : memref<2x32x64xf32, #tpu.memory_space<vmem>>, vector<1x32x64xf32>
    %219 = vector.shape_cast %218 : vector<1x32x64xf32> to vector<32x64xf32>
    %cst_106 = arith.constant dense<0.000000e+00> : vector<16x64xf32>
    %220 = tpu.matmul %217, %219, %cst_106 {dimension_numbers = #tpu.dot_dimension_numbers<[1], [0], [0], [1], [0, 0, 1, 1], [], []>} : vector<16x32xf32>, vector<32x64xf32>, vector<16x64xf32> -> vector<16x64xf32>
    %c0_107 = arith.constant 0 : index
    %c0_108 = arith.constant 0 : index
    %c0_109 = arith.constant 0 : index
    %221 = vector.load %arg9[%c0_107, %c0_108, %c0_109] : memref<2x1x64xf32, #tpu.memory_space<vmem>>, vector<1x1x64xf32>
    %222 = vector.shape_cast %221 : vector<1x1x64xf32> to vector<1x64xf32>
    %223 = vector.broadcast %222 : vector<1x64xf32> to vector<16x64xf32>
    %224 = arith.addf %220, %223 : vector<16x64xf32>
    %225 = arith.mulf %224, %224 : vector<16x64xf32>
    %226 = arith.mulf %224, %225 : vector<16x64xf32>
    %cst_110 = arith.constant 4.471500e-02 : f32
    %227 = vector.broadcast %cst_110 : f32 to vector<16x64xf32>
    %228 = arith.mulf %227, %226 : vector<16x64xf32>
    %229 = arith.addf %224, %228 : vector<16x64xf32>
    %cst_111 = arith.constant 0.797884583 : f32
    %230 = vector.broadcast %cst_111 : f32 to vector<16x64xf32>
    %231 = arith.mulf %230, %229 : vector<16x64xf32>
    %232 = math.tanh %231 : vector<16x64xf32>
    %cst_112 = arith.constant 1.000000e+00 : f32
    %233 = vector.broadcast %cst_112 : f32 to vector<16x64xf32>
    %234 = arith.addf %233, %232 : vector<16x64xf32>
    %cst_113 = arith.constant 5.000000e-01 : f32
    %235 = vector.broadcast %cst_113 : f32 to vector<16x64xf32>
    %236 = arith.mulf %235, %234 : vector<16x64xf32>
    %237 = arith.mulf %224, %236 : vector<16x64xf32>
    %c0_114 = arith.constant 0 : index
    %c0_115 = arith.constant 0 : index
    %c0_116 = arith.constant 0 : index
    %238 = vector.load %arg10[%c0_114, %c0_115, %c0_116] : memref<2x64x32xf32, #tpu.memory_space<vmem>>, vector<1x64x32xf32>
    %239 = vector.shape_cast %238 : vector<1x64x32xf32> to vector<64x32xf32>
    %cst_117 = arith.constant dense<0.000000e+00> : vector<16x32xf32>
    %240 = tpu.matmul %237, %239, %cst_117 {dimension_numbers = #tpu.dot_dimension_numbers<[1], [0], [0], [1], [0, 0, 1, 1], [], []>} : vector<16x64xf32>, vector<64x32xf32>, vector<16x32xf32> -> vector<16x32xf32>
    %c0_118 = arith.constant 0 : index
    %c0_119 = arith.constant 0 : index
    %c0_120 = arith.constant 0 : index
    %241 = vector.load %arg11[%c0_118, %c0_119, %c0_120] : memref<2x1x32xf32, #tpu.memory_space<vmem>>, vector<1x1x32xf32>
    %242 = vector.shape_cast %241 : vector<1x1x32xf32> to vector<1x32xf32>
    %243 = vector.broadcast %242 : vector<1x32xf32> to vector<16x32xf32>
    %244 = arith.addf %240, %243 : vector<16x32xf32>
    %245 = arith.addf %217, %244 : vector<16x32xf32>
    %c0_121 = arith.constant 0 : index
    %c0_122 = arith.constant 0 : index
    %c0_123 = arith.constant 0 : index
    %246 = vector.load %arg12[%c0_121, %c0_122, %c0_123] : memref<2x1x32xf32, #tpu.memory_space<vmem>>, vector<1x1x32xf32>
    %247 = vector.shape_cast %246 : vector<1x1x32xf32> to vector<1x32xf32>
    %c0_124 = arith.constant 0 : index
    %c0_125 = arith.constant 0 : index
    %c0_126 = arith.constant 0 : index
    %248 = vector.load %arg13[%c0_124, %c0_125, %c0_126] : memref<2x1x32xf32, #tpu.memory_space<vmem>>, vector<1x1x32xf32>
    %249 = vector.shape_cast %248 : vector<1x1x32xf32> to vector<1x32xf32>
    %cst_127 = arith.constant dense<0.000000e+00> : vector<16xf32>
    %250 = vector.multi_reduction <add>, %245, %cst_127 [1] : vector<16x32xf32> to vector<16xf32>
    %251 = vector.shape_cast %250 : vector<16xf32> to vector<16x1xf32>
    %cst_128 = arith.constant 3.200000e+01 : f32
    %252 = vector.broadcast %cst_128 : f32 to vector<16x1xf32>
    %253 = arith.divf %251, %252 : vector<16x1xf32>
    %254 = vector.broadcast %253 : vector<16x1xf32> to vector<16x32xf32>
    %255 = arith.subf %245, %254 : vector<16x32xf32>
    %256 = arith.mulf %255, %255 : vector<16x32xf32>
    %cst_129 = arith.constant dense<0.000000e+00> : vector<16xf32>
    %257 = vector.multi_reduction <add>, %256, %cst_129 [1] : vector<16x32xf32> to vector<16xf32>
    %258 = vector.shape_cast %257 : vector<16xf32> to vector<16x1xf32>
    %cst_130 = arith.constant 3.200000e+01 : f32
    %259 = vector.broadcast %cst_130 : f32 to vector<16x1xf32>
    %260 = arith.divf %258, %259 : vector<16x1xf32>
    %261 = vector.broadcast %253 : vector<16x1xf32> to vector<16x32xf32>
    %262 = arith.subf %245, %261 : vector<16x32xf32>
    %cst_131 = arith.constant 9.99999997E-7 : f32
    %263 = vector.broadcast %cst_131 : f32 to vector<16x1xf32>
    %264 = arith.addf %260, %263 : vector<16x1xf32>
    %265 = math.rsqrt %264 : vector<16x1xf32>
    %266 = vector.broadcast %265 : vector<16x1xf32> to vector<16x32xf32>
    %267 = arith.mulf %262, %266 : vector<16x32xf32>
    %268 = vector.broadcast %247 : vector<1x32xf32> to vector<16x32xf32>
    %269 = arith.mulf %267, %268 : vector<16x32xf32>
    %270 = vector.broadcast %249 : vector<1x32xf32> to vector<16x32xf32>
    %271 = arith.addf %269, %270 : vector<16x32xf32>
    %c1_132 = arith.constant 1 : index
    %c0_133 = arith.constant 0 : index
    %c0_134 = arith.constant 0 : index
    %272 = vector.load %arg2[%c1_132, %c0_133, %c0_134] : memref<2x32x96xf32, #tpu.memory_space<vmem>>, vector<1x32x96xf32>
    %273 = vector.shape_cast %272 : vector<1x32x96xf32> to vector<32x96xf32>
    %cst_135 = arith.constant dense<0.000000e+00> : vector<16x96xf32>
    %274 = tpu.matmul %271, %273, %cst_135 {dimension_numbers = #tpu.dot_dimension_numbers<[1], [0], [0], [1], [0, 0, 1, 1], [], []>} : vector<16x32xf32>, vector<32x96xf32>, vector<16x96xf32> -> vector<16x96xf32>
    %c1_136 = arith.constant 1 : index
    %c0_137 = arith.constant 0 : index
    %c0_138 = arith.constant 0 : index
    %275 = vector.load %arg3[%c1_136, %c0_137, %c0_138] : memref<2x1x96xf32, #tpu.memory_space<vmem>>, vector<1x1x96xf32>
    %276 = vector.shape_cast %275 : vector<1x1x96xf32> to vector<1x96xf32>
    %277 = vector.broadcast %276 : vector<1x96xf32> to vector<16x96xf32>
    %278 = arith.addf %274, %277 : vector<16x96xf32>
    %279 = vector.extract_strided_slice %278 {offsets = [0, 0], sizes = [16, 32], strides = [1, 1]} : vector<16x96xf32> to vector<16x32xf32>
    %280 = vector.extract_strided_slice %278 {offsets = [0, 32], sizes = [16, 32], strides = [1, 1]} : vector<16x96xf32> to vector<16x32xf32>
    %281 = vector.extract_strided_slice %278 {offsets = [0, 64], sizes = [16, 32], strides = [1, 1]} : vector<16x96xf32> to vector<16x32xf32>
    %c0_139 = arith.constant 0 : index
    %c0_140 = arith.constant 0 : index
    %c0_141 = arith.constant 0 : index
    %282 = vector.load %arg1[%c0_139, %c0_140, %c0_141] : memref<2x8x8xf32, #tpu.memory_space<vmem>>, vector<1x8x8xf32>
    %283 = vector.shape_cast %282 : vector<1x8x8xf32> to vector<8x8xf32>
    %284 = vector.extract_strided_slice %279 {offsets = [0, 0], sizes = [8, 8], strides = [1, 1]} : vector<16x32xf32> to vector<8x8xf32>
    %285 = vector.extract_strided_slice %280 {offsets = [0, 0], sizes = [8, 8], strides = [1, 1]} : vector<16x32xf32> to vector<8x8xf32>
    %286 = vector.extract_strided_slice %281 {offsets = [0, 0], sizes = [8, 8], strides = [1, 1]} : vector<16x32xf32> to vector<8x8xf32>
    %cst_142 = arith.constant dense<0.000000e+00> : vector<8x8xf32>
    %287 = tpu.matmul %284, %285, %cst_142 {dimension_numbers = #tpu.dot_dimension_numbers<[1], [1], [0], [0], [0, 0, 1, 0], [], []>} : vector<8x8xf32>, vector<8x8xf32>, vector<8x8xf32> -> vector<8x8xf32>
    %cst_143 = arith.constant 0.353553385 : f32
    %288 = vector.broadcast %cst_143 : f32 to vector<8x8xf32>
    %289 = arith.mulf %287, %288 : vector<8x8xf32>
    %290 = arith.addf %289, %283 : vector<8x8xf32>
    %cst_144 = arith.constant dense<0xFF800000> : vector<8xf32>
    %291 = vector.multi_reduction <maximumf>, %290, %cst_144 [1] : vector<8x8xf32> to vector<8xf32>
    %292 = vector.shape_cast %291 : vector<8xf32> to vector<8x1xf32>
    %293 = vector.broadcast %292 : vector<8x1xf32> to vector<8x8xf32>
    %294 = arith.subf %290, %293 : vector<8x8xf32>
    %295 = math.exp %294 : vector<8x8xf32>
    %cst_145 = arith.constant dense<0.000000e+00> : vector<8xf32>
    %296 = vector.multi_reduction <add>, %295, %cst_145 [1] : vector<8x8xf32> to vector<8xf32>
    %297 = vector.shape_cast %296 : vector<8xf32> to vector<8x1xf32>
    %298 = vector.broadcast %297 : vector<8x1xf32> to vector<8x8xf32>
    %299 = arith.divf %295, %298 : vector<8x8xf32>
    %c8_146 = arith.constant 8 : index
    %c0_147 = arith.constant 0 : index
    %c0_148 = arith.constant 0 : index
    %300 = vector.load %arg15[%c8_146, %c0_147, %c0_148] : memref<16x8x8xf32, #tpu.memory_space<vmem>>, vector<1x8x8xf32>
    %301 = vector.shape_cast %300 : vector<1x8x8xf32> to vector<8x8xf32>
    %302 = vector.shape_cast %299 : vector<8x8xf32> to vector<1x8x8xf32>
    tpu.vector_store %arg15[%c8_146, %c0_147, %c0_148], %302 {strides = array<i32>} : memref<16x8x8xf32, #tpu.memory_space<vmem>>, vector<1x8x8xf32>,
    %cst_149 = arith.constant dense<0.000000e+00> : vector<8x8xf32>
    %303 = tpu.matmul %299, %286, %cst_149 {dimension_numbers = #tpu.dot_dimension_numbers<[1], [0], [0], [1], [0, 0, 1, 1], [], []>} : vector<8x8xf32>, vector<8x8xf32>, vector<8x8xf32> -> vector<8x8xf32>
    %c0_150 = arith.constant 0 : index
    %c0_151 = arith.constant 0 : index
    %304 = vector.load %arg16[%c0_150, %c0_151] : memref<16x32xf32, #tpu.memory_space<vmem>>, vector<8x8xf32>
    tpu.vector_store %arg16[%c0_150, %c0_151], %303 {strides = array<i32>} : memref<16x32xf32, #tpu.memory_space<vmem>>, vector<8x8xf32>,
    %305 = vector.extract_strided_slice %279 {offsets = [0, 8], sizes = [8, 8], strides = [1, 1]} : vector<16x32xf32> to vector<8x8xf32>
    %306 = vector.extract_strided_slice %280 {offsets = [0, 8], sizes = [8, 8], strides = [1, 1]} : vector<16x32xf32> to vector<8x8xf32>
    %307 = vector.extract_strided_slice %281 {offsets = [0, 8], sizes = [8, 8], strides = [1, 1]} : vector<16x32xf32> to vector<8x8xf32>
    %cst_152 = arith.constant dense<0.000000e+00> : vector<8x8xf32>
    %308 = tpu.matmul %305, %306, %cst_152 {dimension_numbers = #tpu.dot_dimension_numbers<[1], [1], [0], [0], [0, 0, 1, 0], [], []>} : vector<8x8xf32>, vector<8x8xf32>, vector<8x8xf32> -> vector<8x8xf32>
    %cst_153 = arith.constant 0.353553385 : f32
    %309 = vector.broadcast %cst_153 : f32 to vector<8x8xf32>
    %310 = arith.mulf %308, %309 : vector<8x8xf32>
    %311 = arith.addf %310, %283 : vector<8x8xf32>
    %cst_154 = arith.constant dense<0xFF800000> : vector<8xf32>
    %312 = vector.multi_reduction <maximumf>, %311, %cst_154 [1] : vector<8x8xf32> to vector<8xf32>
    %313 = vector.shape_cast %312 : vector<8xf32> to vector<8x1xf32>
    %314 = vector.broadcast %313 : vector<8x1xf32> to vector<8x8xf32>
    %315 = arith.subf %311, %314 : vector<8x8xf32>
    %316 = math.exp %315 : vector<8x8xf32>
    %cst_155 = arith.constant dense<0.000000e+00> : vector<8xf32>
    %317 = vector.multi_reduction <add>, %316, %cst_155 [1] : vector<8x8xf32> to vector<8xf32>
    %318 = vector.shape_cast %317 : vector<8xf32> to vector<8x1xf32>
    %319 = vector.broadcast %318 : vector<8x1xf32> to vector<8x8xf32>
    %320 = arith.divf %316, %319 : vector<8x8xf32>
    %c9 = arith.constant 9 : index
    %c0_156 = arith.constant 0 : index
    %c0_157 = arith.constant 0 : index
    %321 = vector.load %arg15[%c9, %c0_156, %c0_157] : memref<16x8x8xf32, #tpu.memory_space<vmem>>, vector<1x8x8xf32>
    %322 = vector.shape_cast %321 : vector<1x8x8xf32> to vector<8x8xf32>
    %323 = vector.shape_cast %320 : vector<8x8xf32> to vector<1x8x8xf32>
    tpu.vector_store %arg15[%c9, %c0_156, %c0_157], %323 {strides = array<i32>} : memref<16x8x8xf32, #tpu.memory_space<vmem>>, vector<1x8x8xf32>,
    %cst_158 = arith.constant dense<0.000000e+00> : vector<8x8xf32>
    %324 = tpu.matmul %320, %307, %cst_158 {dimension_numbers = #tpu.dot_dimension_numbers<[1], [0], [0], [1], [0, 0, 1, 1], [], []>} : vector<8x8xf32>, vector<8x8xf32>, vector<8x8xf32> -> vector<8x8xf32>
    %c0_159 = arith.constant 0 : index
    %c8_160 = arith.constant 8 : index
    %325 = vector.load %arg16[%c0_159, %c8_160] : memref<16x32xf32, #tpu.memory_space<vmem>>, vector<8x8xf32>
    tpu.vector_store %arg16[%c0_159, %c8_160], %324 {strides = array<i32>} : memref<16x32xf32, #tpu.memory_space<vmem>>, vector<8x8xf32>,
    %326 = vector.extract_strided_slice %279 {offsets = [0, 16], sizes = [8, 8], strides = [1, 1]} : vector<16x32xf32> to vector<8x8xf32>
    %327 = vector.extract_strided_slice %280 {offsets = [0, 16], sizes = [8, 8], strides = [1, 1]} : vector<16x32xf32> to vector<8x8xf32>
    %328 = vector.extract_strided_slice %281 {offsets = [0, 16], sizes = [8, 8], strides = [1, 1]} : vector<16x32xf32> to vector<8x8xf32>
    %cst_161 = arith.constant dense<0.000000e+00> : vector<8x8xf32>
    %329 = tpu.matmul %326, %327, %cst_161 {dimension_numbers = #tpu.dot_dimension_numbers<[1], [1], [0], [0], [0, 0, 1, 0], [], []>} : vector<8x8xf32>, vector<8x8xf32>, vector<8x8xf32> -> vector<8x8xf32>
    %cst_162 = arith.constant 0.353553385 : f32
    %330 = vector.broadcast %cst_162 : f32 to vector<8x8xf32>
    %331 = arith.mulf %329, %330 : vector<8x8xf32>
    %332 = arith.addf %331, %283 : vector<8x8xf32>
    %cst_163 = arith.constant dense<0xFF800000> : vector<8xf32>
    %333 = vector.multi_reduction <maximumf>, %332, %cst_163 [1] : vector<8x8xf32> to vector<8xf32>
    %334 = vector.shape_cast %333 : vector<8xf32> to vector<8x1xf32>
    %335 = vector.broadcast %334 : vector<8x1xf32> to vector<8x8xf32>
    %336 = arith.subf %332, %335 : vector<8x8xf32>
    %337 = math.exp %336 : vector<8x8xf32>
    %cst_164 = arith.constant dense<0.000000e+00> : vector<8xf32>
    %338 = vector.multi_reduction <add>, %337, %cst_164 [1] : vector<8x8xf32> to vector<8xf32>
    %339 = vector.shape_cast %338 : vector<8xf32> to vector<8x1xf32>
    %340 = vector.broadcast %339 : vector<8x1xf32> to vector<8x8xf32>
    %341 = arith.divf %337, %340 : vector<8x8xf32>
    %c10 = arith.constant 10 : index
    %c0_165 = arith.constant 0 : index
    %c0_166 = arith.constant 0 : index
    %342 = vector.load %arg15[%c10, %c0_165, %c0_166] : memref<16x8x8xf32, #tpu.memory_space<vmem>>, vector<1x8x8xf32>
    %343 = vector.shape_cast %342 : vector<1x8x8xf32> to vector<8x8xf32>
    %344 = vector.shape_cast %341 : vector<8x8xf32> to vector<1x8x8xf32>
    tpu.vector_store %arg15[%c10, %c0_165, %c0_166], %344 {strides = array<i32>} : memref<16x8x8xf32, #tpu.memory_space<vmem>>, vector<1x8x8xf32>,
    %cst_167 = arith.constant dense<0.000000e+00> : vector<8x8xf32>
    %345 = tpu.matmul %341, %328, %cst_167 {dimension_numbers = #tpu.dot_dimension_numbers<[1], [0], [0], [1], [0, 0, 1, 1], [], []>} : vector<8x8xf32>, vector<8x8xf32>, vector<8x8xf32> -> vector<8x8xf32>
    %c0_168 = arith.constant 0 : index
    %c16_169 = arith.constant 16 : index
    %346 = vector.load %arg16[%c0_168, %c16_169] : memref<16x32xf32, #tpu.memory_space<vmem>>, vector<8x8xf32>
    tpu.vector_store %arg16[%c0_168, %c16_169], %345 {strides = array<i32>} : memref<16x32xf32, #tpu.memory_space<vmem>>, vector<8x8xf32>,
    %347 = vector.extract_strided_slice %279 {offsets = [0, 24], sizes = [8, 8], strides = [1, 1]} : vector<16x32xf32> to vector<8x8xf32>
    %348 = vector.extract_strided_slice %280 {offsets = [0, 24], sizes = [8, 8], strides = [1, 1]} : vector<16x32xf32> to vector<8x8xf32>
    %349 = vector.extract_strided_slice %281 {offsets = [0, 24], sizes = [8, 8], strides = [1, 1]} : vector<16x32xf32> to vector<8x8xf32>
    %cst_170 = arith.constant dense<0.000000e+00> : vector<8x8xf32>
    %350 = tpu.matmul %347, %348, %cst_170 {dimension_numbers = #tpu.dot_dimension_numbers<[1], [1], [0], [0], [0, 0, 1, 0], [], []>} : vector<8x8xf32>, vector<8x8xf32>, vector<8x8xf32> -> vector<8x8xf32>
    %cst_171 = arith.constant 0.353553385 : f32
    %351 = vector.broadcast %cst_171 : f32 to vector<8x8xf32>
    %352 = arith.mulf %350, %351 : vector<8x8xf32>
    %353 = arith.addf %352, %283 : vector<8x8xf32>
    %cst_172 = arith.constant dense<0xFF800000> : vector<8xf32>
    %354 = vector.multi_reduction <maximumf>, %353, %cst_172 [1] : vector<8x8xf32> to vector<8xf32>
    %355 = vector.shape_cast %354 : vector<8xf32> to vector<8x1xf32>
    %356 = vector.broadcast %355 : vector<8x1xf32> to vector<8x8xf32>
    %357 = arith.subf %353, %356 : vector<8x8xf32>
    %358 = math.exp %357 : vector<8x8xf32>
    %cst_173 = arith.constant dense<0.000000e+00> : vector<8xf32>
    %359 = vector.multi_reduction <add>, %358, %cst_173 [1] : vector<8x8xf32> to vector<8xf32>
    %360 = vector.shape_cast %359 : vector<8xf32> to vector<8x1xf32>
    %361 = vector.broadcast %360 : vector<8x1xf32> to vector<8x8xf32>
    %362 = arith.divf %358, %361 : vector<8x8xf32>
    %c11 = arith.constant 11 : index
    %c0_174 = arith.constant 0 : index
    %c0_175 = arith.constant 0 : index
    %363 = vector.load %arg15[%c11, %c0_174, %c0_175] : memref<16x8x8xf32, #tpu.memory_space<vmem>>, vector<1x8x8xf32>
    %364 = vector.shape_cast %363 : vector<1x8x8xf32> to vector<8x8xf32>
    %365 = vector.shape_cast %362 : vector<8x8xf32> to vector<1x8x8xf32>
    tpu.vector_store %arg15[%c11, %c0_174, %c0_175], %365 {strides = array<i32>} : memref<16x8x8xf32, #tpu.memory_space<vmem>>, vector<1x8x8xf32>,
    %cst_176 = arith.constant dense<0.000000e+00> : vector<8x8xf32>
    %366 = tpu.matmul %362, %349, %cst_176 {dimension_numbers = #tpu.dot_dimension_numbers<[1], [0], [0], [1], [0, 0, 1, 1], [], []>} : vector<8x8xf32>, vector<8x8xf32>, vector<8x8xf32> -> vector<8x8xf32>
    %c0_177 = arith.constant 0 : index
    %c24_178 = arith.constant 24 : index
    %367 = vector.load %arg16[%c0_177, %c24_178] : memref<16x32xf32, #tpu.memory_space<vmem>>, vector<8x8xf32>
    tpu.vector_store %arg16[%c0_177, %c24_178], %366 {strides = array<i32>} : memref<16x32xf32, #tpu.memory_space<vmem>>, vector<8x8xf32>,
    %c1_179 = arith.constant 1 : index
    %c0_180 = arith.constant 0 : index
    %c0_181 = arith.constant 0 : index
    %368 = vector.load %arg1[%c1_179, %c0_180, %c0_181] : memref<2x8x8xf32, #tpu.memory_space<vmem>>, vector<1x8x8xf32>
    %369 = vector.shape_cast %368 : vector<1x8x8xf32> to vector<8x8xf32>
    %370 = vector.extract_strided_slice %279 {offsets = [8, 0], sizes = [8, 8], strides = [1, 1]} : vector<16x32xf32> to vector<8x8xf32>
    %371 = vector.extract_strided_slice %280 {offsets = [8, 0], sizes = [8, 8], strides = [1, 1]} : vector<16x32xf32> to vector<8x8xf32>
    %372 = vector.extract_strided_slice %281 {offsets = [8, 0], sizes = [8, 8], strides = [1, 1]} : vector<16x32xf32> to vector<8x8xf32>
    %cst_182 = arith.constant dense<0.000000e+00> : vector<8x8xf32>
    %373 = tpu.matmul %370, %371, %cst_182 {dimension_numbers = #tpu.dot_dimension_numbers<[1], [1], [0], [0], [0, 0, 1, 0], [], []>} : vector<8x8xf32>, vector<8x8xf32>, vector<8x8xf32> -> vector<8x8xf32>
    %cst_183 = arith.constant 0.353553385 : f32
    %374 = vector.broadcast %cst_183 : f32 to vector<8x8xf32>
    %375 = arith.mulf %373, %374 : vector<8x8xf32>
    %376 = arith.addf %375, %369 : vector<8x8xf32>
    %cst_184 = arith.constant dense<0xFF800000> : vector<8xf32>
    %377 = vector.multi_reduction <maximumf>, %376, %cst_184 [1] : vector<8x8xf32> to vector<8xf32>
    %378 = vector.shape_cast %377 : vector<8xf32> to vector<8x1xf32>
    %379 = vector.broadcast %378 : vector<8x1xf32> to vector<8x8xf32>
    %380 = arith.subf %376, %379 : vector<8x8xf32>
    %381 = math.exp %380 : vector<8x8xf32>
    %cst_185 = arith.constant dense<0.000000e+00> : vector<8xf32>
    %382 = vector.multi_reduction <add>, %381, %cst_185 [1] : vector<8x8xf32> to vector<8xf32>
    %383 = vector.shape_cast %382 : vector<8xf32> to vector<8x1xf32>
    %384 = vector.broadcast %383 : vector<8x1xf32> to vector<8x8xf32>
    %385 = arith.divf %381, %384 : vector<8x8xf32>
    %c12 = arith.constant 12 : index
    %c0_186 = arith.constant 0 : index
    %c0_187 = arith.constant 0 : index
    %386 = vector.load %arg15[%c12, %c0_186, %c0_187] : memref<16x8x8xf32, #tpu.memory_space<vmem>>, vector<1x8x8xf32>
    %387 = vector.shape_cast %386 : vector<1x8x8xf32> to vector<8x8xf32>
    %388 = vector.shape_cast %385 : vector<8x8xf32> to vector<1x8x8xf32>
    tpu.vector_store %arg15[%c12, %c0_186, %c0_187], %388 {strides = array<i32>} : memref<16x8x8xf32, #tpu.memory_space<vmem>>, vector<1x8x8xf32>,
    %cst_188 = arith.constant dense<0.000000e+00> : vector<8x8xf32>
    %389 = tpu.matmul %385, %372, %cst_188 {dimension_numbers = #tpu.dot_dimension_numbers<[1], [0], [0], [1], [0, 0, 1, 1], [], []>} : vector<8x8xf32>, vector<8x8xf32>, vector<8x8xf32> -> vector<8x8xf32>
    %c8_189 = arith.constant 8 : index
    %c0_190 = arith.constant 0 : index
    %390 = vector.load %arg16[%c8_189, %c0_190] : memref<16x32xf32, #tpu.memory_space<vmem>>, vector<8x8xf32>
    tpu.vector_store %arg16[%c8_189, %c0_190], %389 {strides = array<i32>} : memref<16x32xf32, #tpu.memory_space<vmem>>, vector<8x8xf32>,
    %391 = vector.extract_strided_slice %279 {offsets = [8, 8], sizes = [8, 8], strides = [1, 1]} : vector<16x32xf32> to vector<8x8xf32>
    %392 = vector.extract_strided_slice %280 {offsets = [8, 8], sizes = [8, 8], strides = [1, 1]} : vector<16x32xf32> to vector<8x8xf32>
    %393 = vector.extract_strided_slice %281 {offsets = [8, 8], sizes = [8, 8], strides = [1, 1]} : vector<16x32xf32> to vector<8x8xf32>
    %cst_191 = arith.constant dense<0.000000e+00> : vector<8x8xf32>
    %394 = tpu.matmul %391, %392, %cst_191 {dimension_numbers = #tpu.dot_dimension_numbers<[1], [1], [0], [0], [0, 0, 1, 0], [], []>} : vector<8x8xf32>, vector<8x8xf32>, vector<8x8xf32> -> vector<8x8xf32>
    %cst_192 = arith.constant 0.353553385 : f32
    %395 = vector.broadcast %cst_192 : f32 to vector<8x8xf32>
    %396 = arith.mulf %394, %395 : vector<8x8xf32>
    %397 = arith.addf %396, %369 : vector<8x8xf32>
    %cst_193 = arith.constant dense<0xFF800000> : vector<8xf32>
    %398 = vector.multi_reduction <maximumf>, %397, %cst_193 [1] : vector<8x8xf32> to vector<8xf32>
    %399 = vector.shape_cast %398 : vector<8xf32> to vector<8x1xf32>
    %400 = vector.broadcast %399 : vector<8x1xf32> to vector<8x8xf32>
    %401 = arith.subf %397, %400 : vector<8x8xf32>
    %402 = math.exp %401 : vector<8x8xf32>
    %cst_194 = arith.constant dense<0.000000e+00> : vector<8xf32>
    %403 = vector.multi_reduction <add>, %402, %cst_194 [1] : vector<8x8xf32> to vector<8xf32>
    %404 = vector.shape_cast %403 : vector<8xf32> to vector<8x1xf32>
    %405 = vector.broadcast %404 : vector<8x1xf32> to vector<8x8xf32>
    %406 = arith.divf %402, %405 : vector<8x8xf32>
    %c13 = arith.constant 13 : index
    %c0_195 = arith.constant 0 : index
    %c0_196 = arith.constant 0 : index
    %407 = vector.load %arg15[%c13, %c0_195, %c0_196] : memref<16x8x8xf32, #tpu.memory_space<vmem>>, vector<1x8x8xf32>
    %408 = vector.shape_cast %407 : vector<1x8x8xf32> to vector<8x8xf32>
    %409 = vector.shape_cast %406 : vector<8x8xf32> to vector<1x8x8xf32>
    tpu.vector_store %arg15[%c13, %c0_195, %c0_196], %409 {strides = array<i32>} : memref<16x8x8xf32, #tpu.memory_space<vmem>>, vector<1x8x8xf32>,
    %cst_197 = arith.constant dense<0.000000e+00> : vector<8x8xf32>
    %410 = tpu.matmul %406, %393, %cst_197 {dimension_numbers = #tpu.dot_dimension_numbers<[1], [0], [0], [1], [0, 0, 1, 1], [], []>} : vector<8x8xf32>, vector<8x8xf32>, vector<8x8xf32> -> vector<8x8xf32>
    %c8_198 = arith.constant 8 : index
    %c8_199 = arith.constant 8 : index
    %411 = vector.load %arg16[%c8_198, %c8_199] : memref<16x32xf32, #tpu.memory_space<vmem>>, vector<8x8xf32>
    tpu.vector_store %arg16[%c8_198, %c8_199], %410 {strides = array<i32>} : memref<16x32xf32, #tpu.memory_space<vmem>>, vector<8x8xf32>,
    %412 = vector.extract_strided_slice %279 {offsets = [8, 16], sizes = [8, 8], strides = [1, 1]} : vector<16x32xf32> to vector<8x8xf32>
    %413 = vector.extract_strided_slice %280 {offsets = [8, 16], sizes = [8, 8], strides = [1, 1]} : vector<16x32xf32> to vector<8x8xf32>
    %414 = vector.extract_strided_slice %281 {offsets = [8, 16], sizes = [8, 8], strides = [1, 1]} : vector<16x32xf32> to vector<8x8xf32>
    %cst_200 = arith.constant dense<0.000000e+00> : vector<8x8xf32>
    %415 = tpu.matmul %412, %413, %cst_200 {dimension_numbers = #tpu.dot_dimension_numbers<[1], [1], [0], [0], [0, 0, 1, 0], [], []>} : vector<8x8xf32>, vector<8x8xf32>, vector<8x8xf32> -> vector<8x8xf32>
    %cst_201 = arith.constant 0.353553385 : f32
    %416 = vector.broadcast %cst_201 : f32 to vector<8x8xf32>
    %417 = arith.mulf %415, %416 : vector<8x8xf32>
    %418 = arith.addf %417, %369 : vector<8x8xf32>
    %cst_202 = arith.constant dense<0xFF800000> : vector<8xf32>
    %419 = vector.multi_reduction <maximumf>, %418, %cst_202 [1] : vector<8x8xf32> to vector<8xf32>
    %420 = vector.shape_cast %419 : vector<8xf32> to vector<8x1xf32>
    %421 = vector.broadcast %420 : vector<8x1xf32> to vector<8x8xf32>
    %422 = arith.subf %418, %421 : vector<8x8xf32>
    %423 = math.exp %422 : vector<8x8xf32>
    %cst_203 = arith.constant dense<0.000000e+00> : vector<8xf32>
    %424 = vector.multi_reduction <add>, %423, %cst_203 [1] : vector<8x8xf32> to vector<8xf32>
    %425 = vector.shape_cast %424 : vector<8xf32> to vector<8x1xf32>
    %426 = vector.broadcast %425 : vector<8x1xf32> to vector<8x8xf32>
    %427 = arith.divf %423, %426 : vector<8x8xf32>
    %c14 = arith.constant 14 : index
    %c0_204 = arith.constant 0 : index
    %c0_205 = arith.constant 0 : index
    %428 = vector.load %arg15[%c14, %c0_204, %c0_205] : memref<16x8x8xf32, #tpu.memory_space<vmem>>, vector<1x8x8xf32>
    %429 = vector.shape_cast %428 : vector<1x8x8xf32> to vector<8x8xf32>
    %430 = vector.shape_cast %427 : vector<8x8xf32> to vector<1x8x8xf32>
    tpu.vector_store %arg15[%c14, %c0_204, %c0_205], %430 {strides = array<i32>} : memref<16x8x8xf32, #tpu.memory_space<vmem>>, vector<1x8x8xf32>,
    %cst_206 = arith.constant dense<0.000000e+00> : vector<8x8xf32>
    %431 = tpu.matmul %427, %414, %cst_206 {dimension_numbers = #tpu.dot_dimension_numbers<[1], [0], [0], [1], [0, 0, 1, 1], [], []>} : vector<8x8xf32>, vector<8x8xf32>, vector<8x8xf32> -> vector<8x8xf32>
    %c8_207 = arith.constant 8 : index
    %c16_208 = arith.constant 16 : index
    %432 = vector.load %arg16[%c8_207, %c16_208] : memref<16x32xf32, #tpu.memory_space<vmem>>, vector<8x8xf32>
    tpu.vector_store %arg16[%c8_207, %c16_208], %431 {strides = array<i32>} : memref<16x32xf32, #tpu.memory_space<vmem>>, vector<8x8xf32>,
    %433 = vector.extract_strided_slice %279 {offsets = [8, 24], sizes = [8, 8], strides = [1, 1]} : vector<16x32xf32> to vector<8x8xf32>
    %434 = vector.extract_strided_slice %280 {offsets = [8, 24], sizes = [8, 8], strides = [1, 1]} : vector<16x32xf32> to vector<8x8xf32>
    %435 = vector.extract_strided_slice %281 {offsets = [8, 24], sizes = [8, 8], strides = [1, 1]} : vector<16x32xf32> to vector<8x8xf32>
    %cst_209 = arith.constant dense<0.000000e+00> : vector<8x8xf32>
    %436 = tpu.matmul %433, %434, %cst_209 {dimension_numbers = #tpu.dot_dimension_numbers<[1], [1], [0], [0], [0, 0, 1, 0], [], []>} : vector<8x8xf32>, vector<8x8xf32>, vector<8x8xf32> -> vector<8x8xf32>
    %cst_210 = arith.constant 0.353553385 : f32
    %437 = vector.broadcast %cst_210 : f32 to vector<8x8xf32>
    %438 = arith.mulf %436, %437 : vector<8x8xf32>
    %439 = arith.addf %438, %369 : vector<8x8xf32>
    %cst_211 = arith.constant dense<0xFF800000> : vector<8xf32>
    %440 = vector.multi_reduction <maximumf>, %439, %cst_211 [1] : vector<8x8xf32> to vector<8xf32>
    %441 = vector.shape_cast %440 : vector<8xf32> to vector<8x1xf32>
    %442 = vector.broadcast %441 : vector<8x1xf32> to vector<8x8xf32>
    %443 = arith.subf %439, %442 : vector<8x8xf32>
    %444 = math.exp %443 : vector<8x8xf32>
    %cst_212 = arith.constant dense<0.000000e+00> : vector<8xf32>
    %445 = vector.multi_reduction <add>, %444, %cst_212 [1] : vector<8x8xf32> to vector<8xf32>
    %446 = vector.shape_cast %445 : vector<8xf32> to vector<8x1xf32>
    %447 = vector.broadcast %446 : vector<8x1xf32> to vector<8x8xf32>
    %448 = arith.divf %444, %447 : vector<8x8xf32>
    %c15 = arith.constant 15 : index
    %c0_213 = arith.constant 0 : index
    %c0_214 = arith.constant 0 : index
    %449 = vector.load %arg15[%c15, %c0_213, %c0_214] : memref<16x8x8xf32, #tpu.memory_space<vmem>>, vector<1x8x8xf32>
    %450 = vector.shape_cast %449 : vector<1x8x8xf32> to vector<8x8xf32>
    %451 = vector.shape_cast %448 : vector<8x8xf32> to vector<1x8x8xf32>
    tpu.vector_store %arg15[%c15, %c0_213, %c0_214], %451 {strides = array<i32>} : memref<16x8x8xf32, #tpu.memory_space<vmem>>, vector<1x8x8xf32>,
    %cst_215 = arith.constant dense<0.000000e+00> : vector<8x8xf32>
    %452 = tpu.matmul %448, %435, %cst_215 {dimension_numbers = #tpu.dot_dimension_numbers<[1], [0], [0], [1], [0, 0, 1, 1], [], []>} : vector<8x8xf32>, vector<8x8xf32>, vector<8x8xf32> -> vector<8x8xf32>
    %c8_216 = arith.constant 8 : index
    %c24_217 = arith.constant 24 : index
    %453 = vector.load %arg16[%c8_216, %c24_217] : memref<16x32xf32, #tpu.memory_space<vmem>>, vector<8x8xf32>
    tpu.vector_store %arg16[%c8_216, %c24_217], %452 {strides = array<i32>} : memref<16x32xf32, #tpu.memory_space<vmem>>, vector<8x8xf32>,
    %c0_218 = arith.constant 0 : index
    %c0_219 = arith.constant 0 : index
    %454 = vector.load %arg16[%c0_218, %c0_219] : memref<16x32xf32, #tpu.memory_space<vmem>>, vector<16x32xf32>
    %c1_220 = arith.constant 1 : index
    %c0_221 = arith.constant 0 : index
    %c0_222 = arith.constant 0 : index
    %455 = vector.load %arg4[%c1_220, %c0_221, %c0_222] : memref<2x32x32xf32, #tpu.memory_space<vmem>>, vector<1x32x32xf32>
    %456 = vector.shape_cast %455 : vector<1x32x32xf32> to vector<32x32xf32>
    %cst_223 = arith.constant dense<0.000000e+00> : vector<16x32xf32>
    %457 = tpu.matmul %454, %456, %cst_223 {dimension_numbers = #tpu.dot_dimension_numbers<[1], [0], [0], [1], [0, 0, 1, 1], [], []>} : vector<16x32xf32>, vector<32x32xf32>, vector<16x32xf32> -> vector<16x32xf32>
    %c1_224 = arith.constant 1 : index
    %c0_225 = arith.constant 0 : index
    %c0_226 = arith.constant 0 : index
    %458 = vector.load %arg5[%c1_224, %c0_225, %c0_226] : memref<2x1x32xf32, #tpu.memory_space<vmem>>, vector<1x1x32xf32>
    %459 = vector.shape_cast %458 : vector<1x1x32xf32> to vector<1x32xf32>
    %460 = vector.broadcast %459 : vector<1x32xf32> to vector<16x32xf32>
    %461 = arith.addf %457, %460 : vector<16x32xf32>
    %462 = arith.addf %271, %461 : vector<16x32xf32>
    %c1_227 = arith.constant 1 : index
    %c0_228 = arith.constant 0 : index
    %c0_229 = arith.constant 0 : index
    %463 = vector.load %arg6[%c1_227, %c0_228, %c0_229] : memref<2x1x32xf32, #tpu.memory_space<vmem>>, vector<1x1x32xf32>
    %464 = vector.shape_cast %463 : vector<1x1x32xf32> to vector<1x32xf32>
    %c1_230 = arith.constant 1 : index
    %c0_231 = arith.constant 0 : index
    %c0_232 = arith.constant 0 : index
    %465 = vector.load %arg7[%c1_230, %c0_231, %c0_232] : memref<2x1x32xf32, #tpu.memory_space<vmem>>, vector<1x1x32xf32>
    %466 = vector.shape_cast %465 : vector<1x1x32xf32> to vector<1x32xf32>
    %cst_233 = arith.constant dense<0.000000e+00> : vector<16xf32>
    %467 = vector.multi_reduction <add>, %462, %cst_233 [1] : vector<16x32xf32> to vector<16xf32>
    %468 = vector.shape_cast %467 : vector<16xf32> to vector<16x1xf32>
    %cst_234 = arith.constant 3.200000e+01 : f32
    %469 = vector.broadcast %cst_234 : f32 to vector<16x1xf32>
    %470 = arith.divf %468, %469 : vector<16x1xf32>
    %471 = vector.broadcast %470 : vector<16x1xf32> to vector<16x32xf32>
    %472 = arith.subf %462, %471 : vector<16x32xf32>
    %473 = arith.mulf %472, %472 : vector<16x32xf32>
    %cst_235 = arith.constant dense<0.000000e+00> : vector<16xf32>
    %474 = vector.multi_reduction <add>, %473, %cst_235 [1] : vector<16x32xf32> to vector<16xf32>
    %475 = vector.shape_cast %474 : vector<16xf32> to vector<16x1xf32>
    %cst_236 = arith.constant 3.200000e+01 : f32
    %476 = vector.broadcast %cst_236 : f32 to vector<16x1xf32>
    %477 = arith.divf %475, %476 : vector<16x1xf32>
    %478 = vector.broadcast %470 : vector<16x1xf32> to vector<16x32xf32>
    %479 = arith.subf %462, %478 : vector<16x32xf32>
    %cst_237 = arith.constant 9.99999997E-7 : f32
    %480 = vector.broadcast %cst_237 : f32 to vector<16x1xf32>
    %481 = arith.addf %477, %480 : vector<16x1xf32>
    %482 = math.rsqrt %481 : vector<16x1xf32>
    %483 = vector.broadcast %482 : vector<16x1xf32> to vector<16x32xf32>
    %484 = arith.mulf %479, %483 : vector<16x32xf32>
    %485 = vector.broadcast %464 : vector<1x32xf32> to vector<16x32xf32>
    %486 = arith.mulf %484, %485 : vector<16x32xf32>
    %487 = vector.broadcast %466 : vector<1x32xf32> to vector<16x32xf32>
    %488 = arith.addf %486, %487 : vector<16x32xf32>
    %c1_238 = arith.constant 1 : index
    %c0_239 = arith.constant 0 : index
    %c0_240 = arith.constant 0 : index
    %489 = vector.load %arg8[%c1_238, %c0_239, %c0_240] : memref<2x32x64xf32, #tpu.memory_space<vmem>>, vector<1x32x64xf32>
    %490 = vector.shape_cast %489 : vector<1x32x64xf32> to vector<32x64xf32>
    %cst_241 = arith.constant dense<0.000000e+00> : vector<16x64xf32>
    %491 = tpu.matmul %488, %490, %cst_241 {dimension_numbers = #tpu.dot_dimension_numbers<[1], [0], [0], [1], [0, 0, 1, 1], [], []>} : vector<16x32xf32>, vector<32x64xf32>, vector<16x64xf32> -> vector<16x64xf32>
    %c1_242 = arith.constant 1 : index
    %c0_243 = arith.constant 0 : index
    %c0_244 = arith.constant 0 : index
    %492 = vector.load %arg9[%c1_242, %c0_243, %c0_244] : memref<2x1x64xf32, #tpu.memory_space<vmem>>, vector<1x1x64xf32>
    %493 = vector.shape_cast %492 : vector<1x1x64xf32> to vector<1x64xf32>
    %494 = vector.broadcast %493 : vector<1x64xf32> to vector<16x64xf32>
    %495 = arith.addf %491, %494 : vector<16x64xf32>
    %496 = arith.mulf %495, %495 : vector<16x64xf32>
    %497 = arith.mulf %495, %496 : vector<16x64xf32>
    %cst_245 = arith.constant 4.471500e-02 : f32
    %498 = vector.broadcast %cst_245 : f32 to vector<16x64xf32>
    %499 = arith.mulf %498, %497 : vector<16x64xf32>
    %500 = arith.addf %495, %499 : vector<16x64xf32>
    %cst_246 = arith.constant 0.797884583 : f32
    %501 = vector.broadcast %cst_246 : f32 to vector<16x64xf32>
    %502 = arith.mulf %501, %500 : vector<16x64xf32>
    %503 = math.tanh %502 : vector<16x64xf32>
    %cst_247 = arith.constant 1.000000e+00 : f32
    %504 = vector.broadcast %cst_247 : f32 to vector<16x64xf32>
    %505 = arith.addf %504, %503 : vector<16x64xf32>
    %cst_248 = arith.constant 5.000000e-01 : f32
    %506 = vector.broadcast %cst_248 : f32 to vector<16x64xf32>
    %507 = arith.mulf %506, %505 : vector<16x64xf32>
    %508 = arith.mulf %495, %507 : vector<16x64xf32>
    %c1_249 = arith.constant 1 : index
    %c0_250 = arith.constant 0 : index
    %c0_251 = arith.constant 0 : index
    %509 = vector.load %arg10[%c1_249, %c0_250, %c0_251] : memref<2x64x32xf32, #tpu.memory_space<vmem>>, vector<1x64x32xf32>
    %510 = vector.shape_cast %509 : vector<1x64x32xf32> to vector<64x32xf32>
    %cst_252 = arith.constant dense<0.000000e+00> : vector<16x32xf32>
    %511 = tpu.matmul %508, %510, %cst_252 {dimension_numbers = #tpu.dot_dimension_numbers<[1], [0], [0], [1], [0, 0, 1, 1], [], []>} : vector<16x64xf32>, vector<64x32xf32>, vector<16x32xf32> -> vector<16x32xf32>
    %c1_253 = arith.constant 1 : index
    %c0_254 = arith.constant 0 : index
    %c0_255 = arith.constant 0 : index
    %512 = vector.load %arg11[%c1_253, %c0_254, %c0_255] : memref<2x1x32xf32, #tpu.memory_space<vmem>>, vector<1x1x32xf32>
    %513 = vector.shape_cast %512 : vector<1x1x32xf32> to vector<1x32xf32>
    %514 = vector.broadcast %513 : vector<1x32xf32> to vector<16x32xf32>
    %515 = arith.addf %511, %514 : vector<16x32xf32>
    %516 = arith.addf %488, %515 : vector<16x32xf32>
    %c1_256 = arith.constant 1 : index
    %c0_257 = arith.constant 0 : index
    %c0_258 = arith.constant 0 : index
    %517 = vector.load %arg12[%c1_256, %c0_257, %c0_258] : memref<2x1x32xf32, #tpu.memory_space<vmem>>, vector<1x1x32xf32>
    %518 = vector.shape_cast %517 : vector<1x1x32xf32> to vector<1x32xf32>
    %c1_259 = arith.constant 1 : index
    %c0_260 = arith.constant 0 : index
    %c0_261 = arith.constant 0 : index
    %519 = vector.load %arg13[%c1_259, %c0_260, %c0_261] : memref<2x1x32xf32, #tpu.memory_space<vmem>>, vector<1x1x32xf32>
    %520 = vector.shape_cast %519 : vector<1x1x32xf32> to vector<1x32xf32>
    %cst_262 = arith.constant dense<0.000000e+00> : vector<16xf32>
    %521 = vector.multi_reduction <add>, %516, %cst_262 [1] : vector<16x32xf32> to vector<16xf32>
    %522 = vector.shape_cast %521 : vector<16xf32> to vector<16x1xf32>
    %cst_263 = arith.constant 3.200000e+01 : f32
    %523 = vector.broadcast %cst_263 : f32 to vector<16x1xf32>
    %524 = arith.divf %522, %523 : vector<16x1xf32>
    %525 = vector.broadcast %524 : vector<16x1xf32> to vector<16x32xf32>
    %526 = arith.subf %516, %525 : vector<16x32xf32>
    %527 = arith.mulf %526, %526 : vector<16x32xf32>
    %cst_264 = arith.constant dense<0.000000e+00> : vector<16xf32>
    %528 = vector.multi_reduction <add>, %527, %cst_264 [1] : vector<16x32xf32> to vector<16xf32>
    %529 = vector.shape_cast %528 : vector<16xf32> to vector<16x1xf32>
    %cst_265 = arith.constant 3.200000e+01 : f32
    %530 = vector.broadcast %cst_265 : f32 to vector<16x1xf32>
    %531 = arith.divf %529, %530 : vector<16x1xf32>
    %532 = vector.broadcast %524 : vector<16x1xf32> to vector<16x32xf32>
    %533 = arith.subf %516, %532 : vector<16x32xf32>
    %cst_266 = arith.constant 9.99999997E-7 : f32
    %534 = vector.broadcast %cst_266 : f32 to vector<16x1xf32>
    %535 = arith.addf %531, %534 : vector<16x1xf32>
    %536 = math.rsqrt %535 : vector<16x1xf32>
    %537 = vector.broadcast %536 : vector<16x1xf32> to vector<16x32xf32>
    %538 = arith.mulf %533, %537 : vector<16x32xf32>
    %539 = vector.broadcast %518 : vector<1x32xf32> to vector<16x32xf32>
    %540 = arith.mulf %538, %539 : vector<16x32xf32>
    %541 = vector.broadcast %520 : vector<1x32xf32> to vector<16x32xf32>
    %542 = arith.addf %540, %541 : vector<16x32xf32>
    %c0_267 = arith.constant 0 : index
    %c0_268 = arith.constant 0 : index
    %543 = vector.load %arg14[%c0_267, %c0_268] : memref<16x32xf32, #tpu.memory_space<vmem>>, vector<16x32xf32>
    tpu.vector_store %arg14[%c0_267, %c0_268], %542 {strides = array<i32>} : memref<16x32xf32, #tpu.memory_space<vmem>>, vector<16x32xf32>,
    return
  }
}

</mosaic_0001>

<bundles_post_ra>
// kernel: tpu_custom_call.1
= control target key start
LH: loop header
LB: loop body
LE: loop exit
PB: predicated region body
PF: predicated region fallthrough
CT: control target
= control target key end

     0   :  { %21 = vsyncpa [#allocation4], 0  ;;  %s5423_s0 = inlined_call_operand.hbm [shape: f32[16,32], index: 0, kind: input, shape index: {}]   ;;  %s5424_s1 = inlined_call_operand.hbm [shape: f32[2,8,8], index: 1, kind: input, shape index: {}]   ;;  %s5425_s2 = inlined_call_operand.vmem [shape: f32[2,32,96], index: 2, kind: input, shape index: {}]   ;;  %s5426_s3 = inlined_call_operand.vmem [shape: f32[2,1,96], index: 3, kind: input, shape index: {}]   ;;  %s5427_s4 = inlined_call_operand.vmem [shape: f32[2,32,32], index: 4, kind: input, shape index: {}]   ;;  %s5428_s5 = inlined_call_operand.vmem [shape: f32[2,1,32], index: 5, kind: input, shape index: {}]   ;;  %s5429_s6 = inlined_call_operand.vmem [shape: f32[2,1,32], index: 6, kind: input, shape index: {}]   ;;  %s5430_s7 = inlined_call_operand.vmem [shape: f32[2,1,32], index: 7, kind: input, shape index: {}]   ;;  %s5431_s8 = inlined_call_operand.vmem [shape: f32[2,32,64], index: 8, kind: input, shape index: {}]   ;;  %s5432_s9 = inlined_call_operand.vmem [shape: f32[2,1,64], index: 9, kind: input, shape index: {}]   ;;  %s5433_s10 = inlined_call_operand.vmem [shape: f32[2,64,32], index: 10, kind: input, shape index: {}]   ;;  %s5434_s11 = inlined_call_operand.vmem [shape: f32[2,1,32], index: 11, kind: input, shape index: {}]   ;;  %s5435_s12 = inlined_call_operand.vmem [shape: f32[2,1,32], index: 12, kind: input, shape index: {}]   ;;  %s5436_s13 = inlined_call_operand.vmem [shape: f32[2,1,32], index: 13, kind: input, shape index: {}]   ;;  %s5437_s14 = inlined_call_operand.hbm [shape: f32[16,32], index: 14, kind: output, shape index: {0}]   ;;  %s5438_s15 = inlined_call_operand.vmem [shape: f32[16,8,8], index: 15, kind: output, shape index: {1}]  }
   0x1   :  { %22 = vsyncpa [#allocation7], 0 }
   0x2   :  { %23 = vsyncpa [#allocation5], 0  ;;  %s4626_s18 = smov [#allocation3]   ;;  %s4554_s22 = scalar_lea.hbm %s5423_s0, 256 }
   0x3   :  { %s29_s19 = sshll.u32 %s4626_s18, 4  ;;  %p4555_p0 = scmp.ne.s32.totalorder %s5423_s0, %s4554_s22  ;;  %s30_s19 = int_to_ptr.vmem [resolvable:$true] %s29_s19 }
   0x4   :  { %p4558_p1 = scmp.lt.u32.totalorder %s4554_s22, %s5423_s0 }
   0x6   :  { %p4560_p2 = pnand %p4558_p1, %p4555_p0 }
   0x8   :  { %4563 = shalt.err (!%p4560_p2)
}
   0x9   :  { %s4564_s27 = scalar_lea.vmem %s30_s19, 256  ;;  %p4569_p4 = scmp.lt.s32.totalorder %s30_s19, %s30_s19 }
   0xa   :  { %p4565_p3 = scmp.ne.s32.totalorder %s30_s19, %s4564_s27  ;;  %p4570_p5 = scmp.lt.s32.totalorder %s4564_s27, %s4564_s27 }
   0xc   :  { %p4571_p6 = por %p4570_p5, %p4569_p4 }
   0xe   :  { %p4572_p7 = pnand %p4571_p6, %p4565_p3 }
  0x10   :  { %4575 = shalt.err (!%p4572_p7)
}
  0x11   :  { %s5439_s28 = smov 128   ;;  %s4628_s29 = smov 8  }
  0x12   :  { %35 = dma.hbm_to_vmem [thread:$0]  %s5423_s0, 256, %s30_s19, [#allocation4], %s5439_s28, %s5439_s28, %s4628_s29  }
  0x13   :  { %s4629_s17 = smov [#allocation6]   ;;  %s4576_s22 = scalar_lea.hbm %s5424_s1, 256 }
  0x14   :  { %s41_s18 = sshll.u32 %s4629_s17, 4  ;;  %p4577_p8 = scmp.ne.s32.totalorder %s5424_s1, %s4576_s22  ;;  %s42_s18 = int_to_ptr.vmem [resolvable:$true] %s41_s18 }
  0x15   :  { %p4580_p9 = scmp.lt.u32.totalorder %s4576_s22, %s5424_s1 }
  0x17   :  { %p4582_p10 = pnand %p4580_p9, %p4577_p8 }
  0x19   :  { %4585 = shalt.err (!%p4582_p10)
}
  0x1a   :  { %s4586_s27 = scalar_lea.vmem %s42_s18, 256  ;;  %p4591_p12 = scmp.lt.s32.totalorder %s42_s18, %s42_s18 }
  0x1b   :  { %p4587_p11 = scmp.ne.s32.totalorder %s42_s18, %s4586_s27  ;;  %p4592_p13 = scmp.lt.s32.totalorder %s4586_s27, %s4586_s27 }
  0x1d   :  { %p4593_p0 = por %p4592_p13, %p4591_p12 }
  0x1f   :  { %p4594_p1 = pnand %p4593_p0, %p4587_p11 }
  0x21   :  { %4597 = shalt.err (!%p4594_p1)
}
  0x22   :  { %47 = dma.hbm_to_vmem [thread:$0]  %s5424_s1, 256, %s42_s18, [#allocation7], %s5439_s28, %s5439_s28, %s4628_s29  }
  0x23   :  { %4620 = dma.done.wait [#allocation4], 256  }
  0x24   :  { %4621 = vsyncadd [#allocation4], 4294967040 }
  0x25   :  { %4622 = dma.done.wait [#allocation7], 256  }
  0x26   :  { %4623 = vsyncadd [#allocation7], 4294967040  ;;  %vm91_vm0 = vcmask 261120   ;;  %v80_v0 = vld [vmem:[%s5425_s2] sm:$0xff]  ;;  %v81_v1 = vld [vmem:[%s5425_s2 + $0x8] sm:$0xff]  ;;  %v4630_v8 = vmov 0.0  }
  0x27   :  { %v82_v2 = vld [vmem:[%s5425_s2 + $0x10] sm:$0xff]  ;;  %v4366_v3 = vpack.c.bf16 %v81_v1, %v80_v0  ;;  %v83_v4 = vld [vmem:[%s5425_s2 + $0x18] sm:$0xff]  ;;  %4123 = vmatprep.subr.mxu0 %v4630_v8  ;;  %vm4631_vm1 = vmmov 0   ;;  %v3859_v9 = vld [vmem:[%s5426_s3] ss:$0 sm:$0xff]  ;;  %s4632_s25 = smov 120  }
  0x28   :  { %v4768_v5 = vld [vmem:[#allocation3] sm:$0xff]  ;;  %v4370_v6 = vpack.c.bf16 %v83_v4, %v82_v2  ;;  %v4772_v7 = vld [vmem:[#allocation3 + $0x8] sm:$0xff]  ;;  %4125 = vmatprep.mubr.msk.f32.mxu0 %vm4631_vm1, %v4630_v8  ;;  %s4633_s26 = smov 96   ;;  %s4634_s27 = smov 80   ;;  %vm177_vm2 = vcmask 64512   ;;  %v4861_v30 = vld [vmem:[#allocation6] sm:$0xff] }
  0x29   :  { %4110 = vmatprep.mubr.msk.f32.mxu1 %vm91_vm0, %v4768_v5  ;;  %4367 = vmatprep.subr.bf16.mxu1 %v4366_v3  ;;  %s4635_s0 = smov 88   ;;  %s5448_s19 = smov 72   ;;  %v4870_v50 = vld [vmem:[#allocation6 + $0x8] sm:$0xff]  ;;  %vm516_vm3 = vcmask 130112   ;;  %vm691_vm4 = vcmask 195712   ;;  %vm866_vm5 = vcmask 261312  }
  0x2a   :  { %4369 = vmatpush3.bf16.msra.mxu1 %v4366_v3  ;;  %s4637_s30 = smov 112   ;;  %s4638_s16 = smov 104   ;;  %vm1827_vm6 = vcmask 523264  }
  0x2b   :  { %4371 = vmatprep.subr.bf16.mxu1 %v4370_v6  ;;  %s5444_s17 = smov 56   ;;  %s5446_s20 = smov 64  }
  0x2c   :  { %s5442_s21 = smov 40   ;;  %s5440_s22 = smov 48  }
  0x2d   :  { %s4643_s23 = smov 16   ;;  %s4644_s1 = smov 24  }
  0x2e   :  { %4373 = vmatpush3.bf16.msra.mxu1 %v4370_v6  ;;  %s5451_s24 = smov 64  }
  0x2f   :  { %4113 = vmatprep.subr.mxu1 %v4630_v8 }
  0x31   :  { %4111 = vmatmul.mubr.msk.f32.vlgmr.msra.gmra.mrb[0].mxu1 %vm91_vm0, %v4772_v7 }
  0x32   :  { %4115 = vmatprep.mubr.msk.f32.mxu1 %vm4631_vm1, %v4630_v8 }
 0x104   :  { %v4112_v10 = vpop.f32.mrb[0].mxu1 }
 0x105   :  { %v164_v11 = vpop.f32.mrb[1].mxu1  ;;  %v4799_v13 = vadd.f32 %v4112_v10, %v3859_v9 }
 0x106   :  { %v4785_v12 = vadd.f32 %v3859_v9, %v164_v11 }
 0x108   :  { %343 = vrot.lane.b32.xlu1 %v4785_v12, %s4632_s25  ;;  %175 = vrot.lane.b32.xlu0 %v4785_v12, %s4633_s26 }
 0x10c   :  { %520 = vrot.lane.b32.xlu1 %v4785_v12, %s4634_s27  ;;  %345 = vrot.lane.b32.xlu0 %v4785_v12, %s4635_s0 }
 0x110   :  { %695 = vrot.lane.b32.xlu1 %v4785_v12, %s5448_s19  ;;  %518 = vrot.lane.b32.xlu0 %v4785_v12, %s4637_s30 }
 0x114   :  { %871 = vrot.lane.b32.xlu1 %v4799_v13, %s4633_s26  ;;  %693 = vrot.lane.b32.xlu0 %v4785_v12, %s4638_s16 }
 0x118   :  { %1039 = vrot.lane.b32.xlu1 %v4799_v13, %s4632_s25  ;;  %1041 = vrot.lane.b32.xlu0 %v4799_v13, %s4635_s0 }
 0x11c   :  { %1213 = vrot.lane.b32.xlu1 %v4799_v13, %s4637_s30  ;;  %1215 = vrot.lane.b32.xlu0 %v4799_v13, %s4634_s27 }
 0x120   :  { %1387 = vrot.lane.b32.xlu1 %v4799_v13, %s4638_s16  ;;  %1389 = vrot.lane.b32.xlu0 %v4799_v13, %s5448_s19 }
 0x124   :  { %436 = vrot.lane.b32.xlu1 %v4785_v12, %s5444_s17  ;;  %266 = vrot.lane.b32.xlu0 %v4785_v12, %s5446_s20 }
 0x17a   :  { %v344_v14 = vpop.permute.xlu1 %343  ;;  %v176_v15 = vpop.permute.xlu0 %175 }
 0x17b   :  { %4114 = vmatpush3.xpose.msk.msra.mxu1 %vm177_vm2, %v176_v15 }
 0x17c   :  { %4118 = vmatprep.subr.mxu1 %v4630_v8 }
 0x17e   :  { %v521_v16 = vpop.permute.xlu1 %520  ;;  %4116 = vmatmul.mubr.msk.f32.vlgmr.msra.gmra.mrb[2].mxu1 %vm177_vm2, %v4785_v12  ;;  %v346_v17 = vpop.permute.xlu0 %345 }
 0x17f   :  { %4124 = vmatpush3.xpose.msk.msra.mxu0 %vm177_vm2, %v346_v17  ;;  %4120 = vmatprep.mubr.msk.f32.mxu1 %vm4631_vm1, %v4630_v8 }
 0x180   :  { %4133 = vmatprep.subr.mxu0 %v4630_v8 }
 0x182   :  { %v696_v18 = vpop.permute.xlu1 %695  ;;  %4126 = vmatmul.mubr.msk.f32.vlgmr.msra.gmra.mrb[0].mxu0 %vm177_vm2, %v344_v14  ;;  %v519_v19 = vpop.permute.xlu0 %518 }
 0x183   :  { %4134 = vmatpush3.xpose.msk.msra.mxu0 %vm177_vm2, %v521_v16  ;;  %4135 = vmatprep.mubr.msk.f32.mxu0 %vm4631_vm1, %v4630_v8 }
 0x184   :  { %4143 = vmatprep.subr.mxu0 %v4630_v8 }
 0x186   :  { %4136 = vmatmul.mubr.msk.f32.vlgmr.msra.gmra.mrb[2].mxu0 %vm177_vm2, %v519_v19  ;;  %v694_v20 = vpop.permute.xlu0 %693  ;;  %v872_v21 = vpop.permute.xlu1 %871 }
 0x187   :  { %4144 = vmatpush3.xpose.msk.msra.mxu0 %vm177_vm2, %v696_v18  ;;  %4145 = vmatprep.mubr.msk.f32.mxu0 %vm4631_vm1, %v4630_v8 }
 0x188   :  { %4153 = vmatprep.subr.mxu0 %v4630_v8 }
 0x18a   :  { %4146 = vmatmul.mubr.msk.f32.vlgmr.msra.gmra.mrb[4].mxu0 %vm177_vm2, %v694_v20  ;;  %v1042_v22 = vpop.permute.xlu0 %1041  ;;  %v1040_v23 = vpop.permute.xlu1 %1039 }
 0x18b   :  { %4154 = vmatpush3.xpose.msk.msra.mxu0 %vm177_vm2, %v872_v21  ;;  %4155 = vmatprep.mubr.msk.f32.mxu0 %vm4631_vm1, %v4630_v8 }
 0x18c   :  { %4163 = vmatprep.subr.mxu0 %v4630_v8 }
 0x18e   :  { %4156 = vmatmul.mubr.msk.f32.vlgmr.msra.gmra.mrb[6].mxu0 %vm177_vm2, %v4799_v13  ;;  %v1216_v24 = vpop.permute.xlu0 %1215  ;;  %v1214_v26 = vpop.permute.xlu1 %1213 }
 0x18f   :  { %4164 = vmatpush3.xpose.msk.msra.mxu0 %vm177_vm2, %v1042_v22  ;;  %4165 = vmatprep.mubr.msk.f32.mxu0 %vm4631_vm1, %v4630_v8 }
 0x190   :  { %4173 = vmatprep.subr.mxu0 %v4630_v8 }
 0x192   :  { %4166 = vmatmul.mubr.msk.f32.vlgmr.msra.gmra.mrb[8].mxu0 %vm177_vm2, %v1040_v23  ;;  %v1390_v25 = vpop.permute.xlu0 %1389  ;;  %v1388_v28 = vpop.permute.xlu1 %1387 }
 0x193   :  { %4174 = vmatpush3.xpose.msk.msra.mxu0 %vm177_vm2, %v1216_v24  ;;  %4175 = vmatprep.mubr.msk.f32.mxu0 %vm4631_vm1, %v4630_v8 }
 0x194   :  { %4183 = vmatprep.subr.mxu0 %v4630_v8 }
 0x196   :  { %4176 = vmatmul.mubr.msk.f32.vlgmr.msra.gmra.mrb[10].mxu0 %vm177_vm2, %v1214_v26  ;;  %v267_v27 = vpop.permute.xlu0 %266  ;;  %v4885_v10 = vpop.permute.xlu1 %436 }
 0x197   :  { %4119 = vmatpush3.msra.mxu1 %v267_v27  ;;  %4184 = vmatpush3.xpose.msk.msra.mxu0 %vm177_vm2, %v1390_v25 }
 0x198   :  { %4185 = vmatprep.mubr.msk.f32.mxu0 %vm4631_vm1, %v4630_v8  ;;  %4128 = vmatprep.subr.mxu1 %v4630_v8 }
 0x19a   :  { %4186 = vmatmul.mubr.msk.f32.vlgmr.msra.gmra.mrb[12].mxu0 %vm177_vm2, %v1388_v28 }
 0x251   :  { %v248_v29 = vpop.f32.mrb[2].mxu1 }
 0x252   :  { %v252_v31 = vmul.f32 0.35355338, %v248_v29  ;;  %v4117_v32 = vpop.f32.mrb[3].mxu1 }
 0x254   :  { %v253_v33 = vadd.f32 %v252_v31, %v4861_v30 }
 0x255   :  { %v417_v34 = vpop.f32.mrb[0].mxu0 }
 0x256   :  { %v421_v35 = vmul.f32 0.35355338, %v417_v34  ;;  %v4127_v36 = vpop.f32.mrb[1].mxu0  ;;  %v254_v37 = vsel %vm177_vm2, %v253_v33, -inf }
 0x257   :  { %255 = vmax.xlane.f32.xlu0 %v254_v37 }
 0x258   :  { %v422_v38 = vadd.f32 %v421_v35, %v4861_v30 }
 0x259   :  { %v592_v39 = vpop.f32.mrb[2].mxu0 }
 0x25a   :  { %v596_v40 = vmul.f32 0.35355338, %v592_v39  ;;  %v4137_v41 = vpop.f32.mrb[3].mxu0  ;;  %v423_v42 = vsel %vm177_vm2, %v422_v38, -inf }
 0x25b   :  { %424 = vmax.xlane.f32.xlu1 %v423_v42 }
 0x25c   :  { %v597_v43 = vadd.f32 %v596_v40, %v4861_v30 }
 0x25d   :  { %v767_v44 = vpop.f32.mrb[4].mxu0 }
 0x25e   :  { %v771_v45 = vmul.f32 0.35355338, %v767_v44  ;;  %v4147_v46 = vpop.f32.mrb[5].mxu0  ;;  %v598_v47 = vsel %vm177_vm2, %v597_v43, -inf }
 0x25f   :  { %599 = vmax.xlane.f32.xlu0 %v598_v47 }
 0x260   :  { %v772_v48 = vadd.f32 %v771_v45, %v4861_v30 }
 0x261   :  { %v943_v49 = vpop.f32.mrb[6].mxu0 }
 0x262   :  { %v947_v51 = vmul.f32 0.35355338, %v943_v49  ;;  %v4157_v52 = vpop.f32.mrb[7].mxu0  ;;  %v773_v53 = vsel %vm177_vm2, %v772_v48, -inf }
 0x263   :  { %774 = vmax.xlane.f32.xlu0 %v773_v53 }
 0x264   :  { %v948_v54 = vadd.f32 %v947_v51, %v4870_v50 }
 0x265   :  { %v1113_v55 = vpop.f32.mrb[8].mxu0 }
 0x266   :  { %v1117_v56 = vmul.f32 0.35355338, %v1113_v55  ;;  %v4167_v57 = vpop.f32.mrb[9].mxu0  ;;  %v949_v58 = vsel %vm177_vm2, %v948_v54, -inf }
 0x267   :  { %950 = vmax.xlane.f32.xlu1 %v949_v58 }
 0x268   :  { %v1118_v59 = vadd.f32 %v1117_v56, %v4870_v50 }
 0x269   :  { %v1287_v60 = vpop.f32.mrb[10].mxu0 }
 0x26a   :  { %v1291_v61 = vmul.f32 0.35355338, %v1287_v60  ;;  %v4177_v62 = vpop.f32.mrb[11].mxu0  ;;  %v1119_v63 = vsel %vm177_vm2, %v1118_v59, -inf }
 0x26b   :  { %1120 = vmax.xlane.f32.xlu0 %v1119_v63 }
 0x26c   :  { %v1292_v0 = vadd.f32 %v1291_v61, %v4870_v50 }
 0x26d   :  { %v1461_v1 = vpop.f32.mrb[12].mxu0 }
 0x26e   :  { %v1465_v2 = vmul.f32 0.35355338, %v1461_v1  ;;  %v4187_v3 = vpop.f32.mrb[13].mxu0  ;;  %v1293_v4 = vsel %vm177_vm2, %v1292_v0, -inf }
 0x26f   :  { %1294 = vmax.xlane.f32.xlu1 %v1293_v4 }
 0x270   :  { %v1466_v6 = vadd.f32 %v1465_v2, %v4870_v50 }
 0x272   :  { %v1467_v9 = vsel %vm177_vm2, %v1466_v6, -inf }
 0x273   :  { %1468 = vmax.xlane.f32.xlu0 %v1467_v9 }
 0x280   :  { %786 = vrot.lane.b32.xlu1 %v4785_v12, %s5442_s21 }
 0x289   :  { %611 = vrot.lane.b32.xlu0 %v4785_v12, %s5440_s22 }
 0x2e4   :  { %v256_v11 = vpop.xlane.xlu0 %255 }
 0x2e5   :  { %v257_v14 = vsub.f32 %v253_v33, %v256_v11 }
 0x2e7   :  { %v258_v15 = vmul.f32 1.442695, %v257_v14 }
 0x2e8   :  { %v425_v16 = vpop.xlane.xlu1 %424 }
 0x2e9   :  { %4466 = vpow2.f32 %v258_v15  ;;  %v426_v17 = vsub.f32 %v422_v38, %v425_v16 }
 0x2eb   :  { %v427_v18 = vmul.f32 1.442695, %v426_v17 }
 0x2ec   :  { %v600_v19 = vpop.xlane.xlu0 %599 }
 0x2ed   :  { %4468 = vpow2.f32 %v427_v18  ;;  %v601_v20 = vsub.f32 %v597_v43, %v600_v19 }
 0x2ef   :  { %v602_v21 = vmul.f32 1.442695, %v601_v20 }
 0x2f0   :  { %v775_v22 = vpop.xlane.xlu0 %774 }
 0x2f1   :  { %4470 = vpow2.f32 %v602_v21  ;;  %v776_v23 = vsub.f32 %v772_v48, %v775_v22 }
 0x2f3   :  { %v4467_v24 = vpop.eup %4466  ;;  %v777_v25 = vmul.f32 1.442695, %v776_v23 }
 0x2f4   :  { %v260_v12 = vsel %vm177_vm2, %v4467_v24, 0.0  ;;  %v951_v33 = vpop.xlane.xlu1 %950 }
 0x2f5   :  { %4472 = vpow2.f32 %v777_v25  ;;  %261 = vadd.xlane.f32.xlu1 %v260_v12  ;;  %v952_v34 = vsub.f32 %v948_v54, %v951_v33  ;;  %v1564_v33 = vld [vmem:[%s5427_s4 + $0x8] sm:$0xff] }
 0x2f7   :  { %v4469_v26 = vpop.eup %4468  ;;  %v953_v38 = vmul.f32 1.442695, %v952_v34 }
 0x2f8   :  { %v429_v27 = vsel %vm177_vm2, %v4469_v26, 0.0  ;;  %v1121_v35 = vpop.xlane.xlu0 %1120 }
 0x2f9   :  { %430 = vadd.xlane.f32.xlu0 %v429_v27  ;;  %v1122_v37 = vsub.f32 %v1118_v59, %v1121_v35  ;;  %4474 = vpow2.f32 %v953_v38  ;;  %v1566_v38 = vld [vmem:[%s5427_s4 + $0x18] sm:$0xff] }
 0x2fb   :  { %v4471_v28 = vpop.eup %4470  ;;  %v1123_v41 = vmul.f32 1.442695, %v1122_v37  ;;  %v1565_v37 = vld [vmem:[%s5427_s4 + $0x10] sm:$0xff] }
 0x2fc   :  { %v604_v29 = vsel %vm177_vm2, %v4471_v28, 0.0  ;;  %v1295_v36 = vpop.xlane.xlu1 %1294 }
 0x2fd   :  { %605 = vadd.xlane.f32.xlu1 %v604_v29  ;;  %v1296_v39 = vsub.f32 %v1292_v0, %v1295_v36  ;;  %4476 = vpow2.f32 %v1123_v41 }
 0x2ff   :  { %v4890_v31 = vpop.eup %4472  ;;  %v1297_v42 = vmul.f32 1.442695, %v1296_v39  ;;  %v4378_v39 = vpack.c.bf16 %v1566_v38, %v1565_v37  ;;  %v1814_v37 = vld [vmem:[%s5433_s10 + $0x10] sm:$0xff]  ;;  %v1815_v38 = vld [vmem:[%s5433_s10 + $0x18] sm:$0xff] }
 0x300   :  { %v779_v32 = vsel %vm177_vm2, %v4890_v31, 0.0  ;;  %v1469_v40 = vpop.xlane.xlu0 %1468  ;;  %v787_v54 = vpop.permute.xlu1 %786 }
 0x301   :  { %780 = vadd.xlane.f32.xlu0 %v779_v32  ;;  %v1470_v43 = vsub.f32 %v1466_v6, %v1469_v40  ;;  %4478 = vpow2.f32 %v1297_v42  ;;  %v1563_v32 = vld [vmem:[%s5427_s4] sm:$0xff] }
 0x302   :  { %v4374_v35 = vpack.c.bf16 %v1564_v33, %v1563_v32 }
 0x303   :  { %v1471_v44 = vmul.f32 1.442695, %v1470_v43  ;;  %v4898_v45 = vpop.eup %4474 }
 0x304   :  { %v955_v47 = vsel %vm177_vm2, %v4898_v45, 0.0  ;;  %v612_v55 = vpop.permute.xlu0 %611  ;;  %4375 = vmatprep.subr.bf16.mxu0 %v4374_v35 }
 0x305   :  { %4480 = vpow2.f32 %v1471_v44  ;;  %4377 = vmatpush3.bf16.msra.mxu0 %v4374_v35  ;;  %v1813_v35 = vld [vmem:[%s5433_s10 + $0x8] sm:$0xff] }
 0x306   :  { %4379 = vmatprep.subr.bf16.mxu0 %v4378_v39 }
 0x307   :  { %v4900_v46 = vpop.eup %4476 }
 0x308   :  { %v1125_v51 = vsel %vm177_vm2, %v4900_v46, 0.0 }
 0x309   :  { %4381 = vmatpush3.bf16.msra.mxu0 %v4378_v39  ;;  %v4394_v39 = vpack.c.bf16 %v1815_v38, %v1814_v37 }
 0x30b   :  { %v4904_v48 = vpop.eup %4478 }
 0x30c   :  { %v1299_v49 = vsel %vm177_vm2, %v4904_v48, 0.0 }
 0x30e   :  { %1132 = vrot.lane.b32.xlu1 %v4799_v13, %s5444_s17 }
 0x30f   :  { %v4910_v52 = vpop.eup %4480 }
 0x310   :  { %v1473_v53 = vsel %vm177_vm2, %v4910_v52, 0.0 }
 0x317   :  { %962 = vrot.lane.b32.xlu0 %v4799_v13, %s5446_s20 }
 0x332   :  { %956 = vadd.xlane.f32.xlu1 %v955_v47 }
 0x336   :  { %1300 = vadd.xlane.f32.xlu1 %v1299_v49  ;;  %1126 = vadd.xlane.f32.xlu0 %v1125_v51 }
 0x33a   :  { %1474 = vadd.xlane.f32.xlu1 %v1473_v53 }
 0x34b   :  { %1480 = vrot.lane.b32.xlu1 %v4799_v13, %s5442_s21 }
 0x34c   :  { %1306 = vrot.lane.b32.xlu0 %v4799_v13, %s5440_s22 }
 0x382   :  { %v262_v56 = vpop.xlane.xlu1 %261 }
 0x383   :  { %4482 = vrcp.f32 %v262_v56 }
 0x386   :  { %v431_v57 = vpop.xlane.xlu0 %430 }
 0x387   :  { %4484 = vrcp.f32 %v431_v57 }
 0x38a   :  { %v606_v58 = vpop.xlane.xlu1 %605 }
 0x38b   :  { %4486 = vrcp.f32 %v606_v58 }
 0x38d   :  { %v4483_v59 = vpop.eup %4482 }
 0x38e   :  { %v264_v60 = vmul.f32 %v4483_v59, %v4467_v24  ;;  %v781_v61 = vpop.xlane.xlu0 %780  ;;  %v1133_v4 = vpop.permute.xlu1 %1132 }
 0x38f   :  { %4488 = vrcp.f32 %v781_v61 }
 0x390   :  { %265 = vst.msk [vmem:[%s5438_s15] sm:$0xff] %vm177_vm2, %v264_v60  ;;  %4121 = vmatmul.mubr.msk.f32.vlgmr.msra.gmra.mrb[4].mxu1 %vm177_vm2, %v264_v60 }
 0x391   :  { %v4485_v13 = vpop.eup %4484  ;;  %4129 = vmatpush3.msra.mxu1 %v4885_v10  ;;  %4130 = vmatprep.mubr.msk.f32.mxu1 %vm4631_vm1, %v4630_v8 }
 0x392   :  { %v433_v62 = vmul.f32 %v4485_v13, %v4469_v26  ;;  %4138 = vmatprep.subr.mxu1 %v4630_v8  ;;  %v963_v3 = vpop.permute.xlu0 %962 }
 0x394   :  { %3867 = vst.msk [vmem:[%s5438_s15 + $0x8] sm:$0xff] %vm177_vm2, %v433_v62  ;;  %4131 = vmatmul.mubr.msk.f32.vlgmr.msra.gmra.mrb[6].mxu1 %vm177_vm2, %v433_v62 }
 0x395   :  { %v4487_v63 = vpop.eup %4486  ;;  %4139 = vmatpush3.msra.mxu1 %v612_v55  ;;  %4140 = vmatprep.mubr.msk.f32.mxu1 %vm4631_vm1, %v4630_v8  ;;  %v3893_v55 = vld [vmem:[%s5428_s5] ss:$0 sm:$0xff] }
 0x396   :  { %v608_v0 = vmul.f32 %v4487_v63, %v4471_v28  ;;  %4148 = vmatprep.subr.mxu1 %v4630_v8 }
 0x398   :  { %3871 = vst.msk [vmem:[%s5438_s15 + $0x10] sm:$0xff] %vm177_vm2, %v608_v0  ;;  %4141 = vmatmul.mubr.msk.f32.vlgmr.msra.gmra.mrb[8].mxu1 %vm177_vm2, %v608_v0 }
 0x399   :  { %v4489_v1 = vpop.eup %4488  ;;  %4149 = vmatpush3.msra.mxu1 %v787_v54  ;;  %4150 = vmatprep.mubr.msk.f32.mxu1 %vm4631_vm1, %v4630_v8 }
 0x39a   :  { %v783_v2 = vmul.f32 %v4489_v1, %v4890_v31  ;;  %4158 = vmatprep.subr.mxu1 %v4630_v8 }
 0x39c   :  { %3875 = vst.msk [vmem:[%s5438_s15 + $0x18] sm:$0xff] %vm177_vm2, %v783_v2  ;;  %4151 = vmatmul.mubr.msk.f32.vlgmr.msra.gmra.mrb[10].mxu1 %vm177_vm2, %v783_v2 }
 0x39d   :  { %4159 = vmatpush3.msra.mxu1 %v963_v3  ;;  %4160 = vmatprep.mubr.msk.f32.mxu1 %vm4631_vm1, %v4630_v8 }
 0x39e   :  { %4168 = vmatprep.subr.mxu1 %v4630_v8 }
 0x3bf   :  { %v957_v6 = vpop.xlane.xlu1 %956 }
 0x3c0   :  { %4490 = vrcp.f32 %v957_v6 }
 0x3c3   :  { %v1301_v9 = vpop.xlane.xlu1 %1300  ;;  %v1127_v10 = vpop.xlane.xlu0 %1126 }
 0x3c4   :  { %4492 = vrcp.f32 %v1301_v9 }
 0x3c5   :  { %4494 = vrcp.f32 %v1127_v10 }
 0x3c7   :  { %v1475_v11 = vpop.xlane.xlu1 %1474  ;;  %v1307_v21 = vpop.permute.xlu0 %1306 }
 0x3c8   :  { %4496 = vrcp.f32 %v1475_v11  ;;  %v1703_v11 = vld [vmem:[%s5431_s8 + $0x8] sm:$0xff] }
 0x3ca   :  { %v4491_v14 = vpop.eup %4490 }
 0x3cb   :  { %v959_v15 = vmul.f32 %v4491_v14, %v4898_v45  ;;  %v1481_v23 = vpop.permute.xlu1 %1480 }
 0x3cd   :  { %3879 = vst.msk [vmem:[%s5438_s15 + $0x20] sm:$0xff] %vm177_vm2, %v959_v15  ;;  %4161 = vmatmul.mubr.msk.f32.vlgmr.msra.gmra.mrb[12].mxu1 %vm177_vm2, %v959_v15  ;;  %v1704_v15 = vld [vmem:[%s5431_s8 + $0x10] sm:$0xff] }
 0x3ce   :  { %v4493_v16 = vpop.eup %4492  ;;  %4169 = vmatpush3.msra.mxu1 %v1133_v4  ;;  %4170 = vmatprep.mubr.msk.f32.mxu1 %vm4631_vm1, %v4630_v8 }
 0x3cf   :  { %v4495_v17 = vpop.eup %4494  ;;  %v1303_v18 = vmul.f32 %v4493_v16, %v4904_v48  ;;  %4178 = vmatprep.subr.mxu1 %v4630_v8  ;;  %v1705_v16 = vld [vmem:[%s5431_s8 + $0x18] sm:$0xff] }
 0x3d0   :  { %v1129_v19 = vmul.f32 %v4495_v17, %v4900_v46  ;;  %v4386_v17 = vpack.c.bf16 %v1705_v16, %v1704_v15 }
 0x3d1   :  { %3887 = vst.msk [vmem:[%s5438_s15 + $0x30] sm:$0xff] %vm177_vm2, %v1303_v18 }
 0x3d2   :  { %v4497_v20 = vpop.eup %4496  ;;  %3883 = vst.msk [vmem:[%s5438_s15 + $0x28] sm:$0xff] %vm177_vm2, %v1129_v19  ;;  %4171 = vmatmul.mubr.msk.f32.vlgmr.msra.gmra.mrb[14].mxu1 %vm177_vm2, %v1129_v19 }
 0x3d3   :  { %v1477_v22 = vmul.f32 %v4497_v20, %v4910_v52  ;;  %4179 = vmatpush3.msra.mxu1 %v1307_v21  ;;  %4180 = vmatprep.mubr.msk.f32.mxu1 %vm4631_vm1, %v4630_v8 }
 0x3d4   :  { %4188 = vmatprep.subr.mxu1 %v4630_v8 }
 0x3d5   :  { %3891 = vst.msk [vmem:[%s5438_s15 + $0x38] sm:$0xff] %vm177_vm2, %v1477_v22 }
 0x3d6   :  { %4181 = vmatmul.mubr.msk.f32.vlgmr.msra.gmra.mrb[16].mxu1 %vm177_vm2, %v1303_v18 }
 0x3d7   :  { %4189 = vmatpush3.msra.mxu1 %v1481_v23  ;;  %4190 = vmatprep.mubr.msk.f32.mxu1 %vm4631_vm1, %v4630_v8 }
 0x3da   :  { %4191 = vmatmul.mubr.msk.f32.vlgmr.msra.gmra.mrb[18].mxu1 %vm177_vm2, %v1477_v22 }
 0x463   :  { %v338_v24 = vpop.f32.mrb[4].mxu1 }
 0x464   :  { %342 = vst.msk [vmem:[#allocation2] sm:$0xff] %vm177_vm2, %v338_v24  ;;  %v4122_v25 = vpop.f32.mrb[5].mxu1 }
 0x465   :  { %v3896_v25 = vld [vmem:[%s5429_s6] ss:$0 sm:$0xff] }
 0x467   :  { %v508_v12 = vpop.f32.mrb[6].mxu1 }
 0x468   :  { %513 = vrot.lane.b32.xlu0 %v508_v12, %s4628_s29  ;;  %v4132_v26 = vpop.f32.mrb[7].mxu1 }
 0x469   :  { %v3897_v26 = vld [vmem:[%s5430_s7] ss:$0 sm:$0xff] }
 0x46b   :  { %v683_v27 = vpop.f32.mrb[8].mxu1 }
 0x46c   :  { %688 = vrot.lane.b32.xlu1 %v683_v27, %s4643_s23  ;;  %v4142_v28 = vpop.f32.mrb[9].mxu1 }
 0x46f   :  { %v858_v29 = vpop.f32.mrb[10].mxu1 }
 0x470   :  { %863 = vrot.lane.b32.xlu1 %v858_v29, %s4644_s1  ;;  %v4152_v31 = vpop.f32.mrb[11].mxu1 }
 0x4a0   :  { %v1034_v34 = vpop.f32.mrb[12].mxu1 }
 0x4a1   :  { %1038 = vst.msk [vmem:[#allocation2 + $0x8] sm:$0xff] %vm177_vm2, %v1034_v34  ;;  %v4162_v36 = vpop.f32.mrb[13].mxu1  ;;  %v1812_v34 = vld [vmem:[%s5433_s10] sm:$0xff] }
 0x4a2   :  { %v4390_v36 = vpack.c.bf16 %v1813_v35, %v1812_v34 }
 0x4a4   :  { %4391 = vmatprep.subr.bf16.mxu0 %v4390_v36 }
 0x4a5   :  { %v1204_v40 = vpop.f32.mrb[14].mxu1 }
 0x4a6   :  { %1209 = vrot.lane.b32.xlu0 %v1204_v40, %s4628_s29  ;;  %v4172_v41 = vpop.f32.mrb[15].mxu1  ;;  %v1816_v40 = vld [vmem:[%s5433_s10 + $0x20] sm:$0xff] }
 0x4a7   :  { %v1817_v41 = vld [vmem:[%s5433_s10 + $0x28] sm:$0xff] }
 0x4a9   :  { %v1378_v42 = vpop.f32.mrb[16].mxu1 }
 0x4aa   :  { %1383 = vrot.lane.b32.xlu0 %v1378_v42, %s4643_s23  ;;  %v4182_v43 = vpop.f32.mrb[17].mxu1  ;;  %v4398_v42 = vpack.c.bf16 %v1817_v41, %v1816_v40  ;;  %v3904_v40 = vld [vmem:[%s5435_s12] ss:$0 sm:$0xff] }
 0x4ab   :  { %v1818_v43 = vld [vmem:[%s5433_s10 + $0x30] sm:$0xff] }
 0x4ad   :  { %v1552_v44 = vpop.f32.mrb[18].mxu1 }
 0x4ae   :  { %1557 = vrot.lane.b32.xlu1 %v1552_v44, %s4644_s1  ;;  %v4192_v45 = vpop.f32.mrb[19].mxu1  ;;  %v1819_v44 = vld [vmem:[%s5433_s10 + $0x38] sm:$0xff] }
 0x4af   :  { %v4402_v45 = vpack.c.bf16 %v1819_v44, %v1818_v43  ;;  %v3905_v44 = vld [vmem:[%s5436_s13] ss:$0 sm:$0xff] }
 0x4da   :  { %v514_v46 = vpop.permute.xlu0 %513 }
 0x4db   :  { %517 = vst.msk [vmem:[#allocation2] sm:$0xff] %vm516_vm3, %v514_v46  ;;  %v3898_v46 = vld [vmem:[%s5432_s9] ss:$0 sm:$0xff] }
 0x4de   :  { %v689_v47 = vpop.permute.xlu1 %688 }
 0x4df   :  { %692 = vst.msk [vmem:[#allocation2] sm:$0xff] %vm691_vm4, %v689_v47 }
 0x4e2   :  { %v864_v48 = vpop.permute.xlu1 %863 }
 0x4e3   :  { %867 = vst.msk [vmem:[#allocation2] sm:$0xff] %vm866_vm5, %v864_v48 }
 0x4ea   :  { %v1561_v49 = vld [vmem:[#allocation2] sm:$0xff] }
 0x4eb   :  { %4201 = vmatprep.mubr.msk.f32.mxu0 %vm91_vm0, %v1561_v49 }
 0x518   :  { %v1210_v51 = vpop.permute.xlu0 %1209 }
 0x519   :  { %1212 = vst.msk [vmem:[#allocation2 + $0x8] sm:$0xff] %vm516_vm3, %v1210_v51 }
 0x51c   :  { %v1384_v52 = vpop.permute.xlu0 %1383 }
 0x51d   :  { %1386 = vst.msk [vmem:[#allocation2 + $0x8] sm:$0xff] %vm691_vm4, %v1384_v52 }
 0x520   :  { %v1558_v53 = vpop.permute.xlu1 %1557 }
 0x521   :  { %1560 = vst.msk [vmem:[#allocation2 + $0x8] sm:$0xff] %vm866_vm5, %v1558_v53 }
 0x528   :  { %v1562_v54 = vld [vmem:[#allocation2 + $0x8] sm:$0xff] }
 0x529   :  { %4202 = vmatmul.mubr.msk.f32.vlgmr.msra.gmra.mrb[14].mxu0 %vm91_vm0, %v1562_v54 }
 0x52a   :  { %4393 = vmatpush3.bf16.msra.mxu0 %v4390_v36 }
 0x52b   :  { %4395 = vmatprep.subr.bf16.mxu0 %v4394_v39 }
 0x52e   :  { %4397 = vmatpush3.bf16.msra.mxu0 %v4394_v39 }
 0x52f   :  { %4399 = vmatprep.subr.bf16.mxu0 %v4398_v42 }
 0x532   :  { %4401 = vmatpush3.bf16.msra.mxu0 %v4398_v42 }
 0x533   :  { %4403 = vmatprep.subr.bf16.mxu0 %v4402_v45 }
 0x536   :  { %4405 = vmatpush3.bf16.msra.mxu0 %v4402_v45 }
 0x537   :  { %4255 = vmatprep.subr.mxu0 %v4630_v8 }
 0x5fc   :  { %v4203_v56 = vpop.f32.mrb[14].mxu0 }
 0x5fd   :  { %v1652_v57 = vadd.f32 %v4203_v56, %v3893_v55  ;;  %v1646_v58 = vpop.f32.mrb[15].mxu0 }
 0x5fe   :  { %v1647_v59 = vadd.f32 %v3893_v55, %v1646_v58 }
 0x5ff   :  { %v1656_v60 = vadd.f32 %v1652_v57, %v4772_v7 }
 0x600   :  { %v1655_v61 = vadd.f32 %v1647_v59, %v4768_v5  ;;  %v1702_v5 = vld [vmem:[%s5431_s8] sm:$0xff] }
 0x601   :  { %v1662_v13 = vsel %vm91_vm0, %v1656_v60, 0.0  ;;  %v4382_v14 = vpack.c.bf16 %v1703_v11, %v1702_v5 }
 0x602   :  { %1663 = vadd.xlane.f32.xlu1 %v1662_v13  ;;  %v1659_v62 = vsel %vm91_vm0, %v1655_v61, 0.0 }
 0x603   :  { %1660 = vadd.xlane.f32.xlu0 %v1659_v62  ;;  %4383 = vmatprep.subr.bf16.mxu1 %v4382_v14 }
 0x604   :  { %4385 = vmatpush3.bf16.msra.mxu1 %v4382_v14 }
 0x605   :  { %4387 = vmatprep.subr.bf16.mxu1 %v4386_v17 }
 0x608   :  { %4389 = vmatpush3.bf16.msra.mxu1 %v4386_v17 }
 0x68f   :  { %v1664_v63 = vpop.xlane.xlu1 %1663 }
 0x690   :  { %v1667_v0 = vmul.f32 0.03125, %v1664_v63  ;;  %v1661_v1 = vpop.xlane.xlu0 %1660 }
 0x691   :  { %v1666_v2 = vmul.f32 0.03125, %v1661_v1 }
 0x692   :  { %v1669_v3 = vsub.f32 %v1656_v60, %v1667_v0 }
 0x693   :  { %v1668_v4 = vsub.f32 %v1655_v61, %v1666_v2 }
 0x694   :  { %v1671_v10 = vmul.f32 %v1669_v3, %v1669_v3 }
 0x695   :  { %v1670_v6 = vmul.f32 %v1668_v4, %v1668_v4 }
 0x696   :  { %v1675_v7 = vsel %vm91_vm0, %v1671_v10, 0.0 }
 0x697   :  { %v1672_v9 = vsel %vm91_vm0, %v1670_v6, 0.0  ;;  %v3901_v6 = vld [vmem:[%s5434_s11] ss:$0 sm:$0xff] }
 0x698   :  { %1673 = vadd.xlane.f32.xlu0 %v1672_v9 }
 0x69c   :  { %1676 = vadd.xlane.f32.xlu0 %v1675_v7 }
 0x725   :  { %v1674_v18 = vpop.xlane.xlu0 %1673 }
 0x726   :  { %v1678_v19 = vmul.f32 0.03125, %v1674_v18 }
 0x728   :  { %v1680_v20 = vadd.f32 1e-06, %v1678_v19 }
 0x729   :  { %v1677_v21 = vpop.xlane.xlu0 %1676 }
 0x72a   :  { %4498 = vrsqrt.f32 %v1680_v20  ;;  %v1679_v22 = vmul.f32 0.03125, %v1677_v21 }
 0x72c   :  { %v1681_v23 = vadd.f32 1e-06, %v1679_v22 }
 0x72e   :  { %4500 = vrsqrt.f32 %v1681_v23 }
 0x734   :  { %v4499_v24 = vpop.eup %4498 }
 0x735   :  { %v1684_v12 = vmul.f32 %v4499_v24, %v1668_v4 }
 0x737   :  { %v1692_v27 = vmul.f32 %v3896_v25, %v1684_v12 }
 0x738   :  { %v4501_v28 = vpop.eup %4500 }
 0x739   :  { %v1685_v29 = vmul.f32 %v4501_v28, %v1669_v3  ;;  %v1700_v31 = vadd.f32 %v3897_v26, %v1692_v27  ;;  %v3907_v27 = vld [vmem:[%s5425_s2 + $0x28] sm:$0xff] }
 0x73b   :  { %v1693_v32 = vmul.f32 %v3896_v25, %v1685_v29  ;;  %4212 = vmatprep.mubr.msk.f32.mxu1 %vm91_vm0, %v1700_v31  ;;  %v3908_v29 = vld [vmem:[%s5425_s2 + $0x30] sm:$0xff] }
 0x73d   :  { %v1701_v33 = vadd.f32 %v3897_v26, %v1693_v32  ;;  %v3906_v26 = vld [vmem:[%s5425_s2 + $0x20] sm:$0xff] }
 0x73e   :  { %v4406_v28 = vpack.c.bf16 %v3907_v27, %v3906_v26 }
 0x73f   :  { %4213 = vmatmul.mubr.msk.f32.vlgmr.msra.gmra.mrb[20].mxu1 %vm91_vm0, %v1701_v33 }
 0x740   :  { %4407 = vmatprep.subr.bf16.mxu1 %v4406_v28 }
 0x741   :  { %4409 = vmatpush3.bf16.msra.mxu1 %v4406_v28 }
 0x812   :  { %v4214_v47 = vpop.f32.mrb[20].mxu1 }
 0x813   :  { %v1791_v48 = vadd.f32 %v4214_v47, %v3898_v46  ;;  %v1785_v49 = vpop.f32.mrb[21].mxu1 }
 0x814   :  { %v1786_v51 = vadd.f32 %v3898_v46, %v1785_v49  ;;  %v3911_v49 = vld [vmem:[%s5426_s3 + $0x1] ss:$0 sm:$0xff]  ;;  %s5450_s3 = smov 72  }
 0x815   :  { %v1795_v52 = vmul.f32 %v1791_v48, %v1791_v48 }
 0x816   :  { %v1794_v53 = vmul.f32 %v1786_v51, %v1786_v51 }
 0x817   :  { %v1797_v54 = vmul.f32 %v1795_v52, %v1791_v48 }
 0x818   :  { %v1796_v55 = vmul.f32 %v1794_v53, %v1786_v51 }
 0x819   :  { %v1799_v56 = vmul.f32 0.044715, %v1797_v54 }
 0x81a   :  { %v1798_v57 = vmul.f32 0.044715, %v1796_v55 }
 0x81b   :  { %v1801_v58 = vadd.f32 %v1799_v56, %v1791_v48 }
 0x81c   :  { %v1800_v59 = vadd.f32 %v1798_v57, %v1786_v51 }
 0x81d   :  { %v1803_v60 = vmul.f32 0.7978846, %v1801_v58 }
 0x81e   :  { %v1802_v61 = vmul.f32 0.7978846, %v1800_v59 }
 0x81f   :  { %4502 = vtanh.f32 %v1803_v60 }
 0x820   :  { %4504 = vtanh.f32 %v1802_v61 }
 0x829   :  { %v4503_v13 = vpop.eup %4502 }
 0x82a   :  { %v4505_v62 = vpop.eup %4504  ;;  %v1807_v63 = vadd.f32 1.0, %v4503_v13 }
 0x82b   :  { %v1806_v0 = vadd.f32 1.0, %v4505_v62 }
 0x82c   :  { %v1809_v1 = vmul.f32 0.5, %v1807_v63 }
 0x82d   :  { %v1808_v2 = vmul.f32 0.5, %v1806_v0 }
 0x82e   :  { %v1811_v4 = vmul.f32 %v1809_v1, %v1791_v48 }
 0x82f   :  { %v1810_v3 = vmul.f32 %v1808_v2, %v1786_v51 }
 0x831   :  { %4231 = vmatprep.mubr.msk.f32.mxu0 %vm1827_vm6, %v1810_v3 }
 0x832   :  { %4232 = vmatmul.mubr.msk.f32.vlgmr.msra.gmra.mrb[16].mxu0 %vm1827_vm6, %v1811_v4 }
 0x833   :  { %4257 = vmatprep.mubr.msk.f32.mxu0 %vm4631_vm1, %v4630_v8 }
 0x905   :  { %v4233_v9 = vpop.f32.mrb[16].mxu0 }
 0x906   :  { %v1906_v10 = vadd.f32 %v4233_v9, %v3901_v6  ;;  %v1900_v7 = vpop.f32.mrb[17].mxu0 }
 0x907   :  { %v1901_v5 = vadd.f32 %v3901_v6, %v1900_v7 }
 0x908   :  { %v1910_v11 = vadd.f32 %v1906_v10, %v1701_v33 }
 0x909   :  { %v1909_v14 = vadd.f32 %v1901_v5, %v1700_v31  ;;  %v3909_v31 = vld [vmem:[%s5425_s2 + $0x38] sm:$0xff] }
 0x90a   :  { %v1916_v15 = vsel %vm91_vm0, %v1910_v11, 0.0  ;;  %v4410_v32 = vpack.c.bf16 %v3909_v31, %v3908_v29 }
 0x90b   :  { %1917 = vadd.xlane.f32.xlu0 %v1916_v15  ;;  %v1913_v16 = vsel %vm91_vm0, %v1909_v14, 0.0 }
 0x90c   :  { %1914 = vadd.xlane.f32.xlu1 %v1913_v16  ;;  %4411 = vmatprep.subr.bf16.mxu1 %v4410_v32 }
 0x90d   :  { %4413 = vmatpush3.bf16.msra.mxu1 %v4410_v32 }
 0x90e   :  { %4245 = vmatprep.subr.mxu1 %v4630_v8 }
 0x998   :  { %v1918_v17 = vpop.xlane.xlu0 %1917 }
 0x999   :  { %v1920_v18 = vmul.f32 0.03125, %v1918_v17  ;;  %v1915_v19 = vpop.xlane.xlu1 %1914 }
 0x99a   :  { %v1919_v20 = vmul.f32 0.03125, %v1915_v19 }
 0x99b   :  { %v1922_v21 = vsub.f32 %v1910_v11, %v1920_v18 }
 0x99c   :  { %v1921_v22 = vsub.f32 %v1909_v14, %v1919_v20 }
 0x99d   :  { %v1924_v23 = vmul.f32 %v1922_v21, %v1922_v21 }
 0x99e   :  { %v1923_v24 = vmul.f32 %v1921_v22, %v1921_v22 }
 0x99f   :  { %v1928_v25 = vsel %vm91_vm0, %v1924_v23, 0.0 }
 0x9a0   :  { %1929 = vadd.xlane.f32.xlu0 %v1928_v25  ;;  %v1925_v12 = vsel %vm91_vm0, %v1923_v24, 0.0 }
 0x9a1   :  { %1926 = vadd.xlane.f32.xlu1 %v1925_v12 }
 0xa2d   :  { %v1930_v33 = vpop.xlane.xlu0 %1929 }
 0xa2e   :  { %v1932_v34 = vmul.f32 0.03125, %v1930_v33  ;;  %v1927_v35 = vpop.xlane.xlu1 %1926 }
 0xa2f   :  { %v1931_v36 = vmul.f32 0.03125, %v1927_v35 }
 0xa30   :  { %v1934_v37 = vadd.f32 1e-06, %v1932_v34 }
 0xa31   :  { %v1933_v38 = vadd.f32 1e-06, %v1931_v36 }
 0xa32   :  { %4506 = vrsqrt.f32 %v1934_v37 }
 0xa33   :  { %4508 = vrsqrt.f32 %v1933_v38 }
 0xa3c   :  { %v4507_v39 = vpop.eup %4506 }
 0xa3d   :  { %v4509_v41 = vpop.eup %4508  ;;  %v1938_v42 = vmul.f32 %v4507_v39, %v1922_v21 }
 0xa3e   :  { %v1937_v43 = vmul.f32 %v4509_v41, %v1921_v22 }
 0xa3f   :  { %v1946_v45 = vmul.f32 %v3904_v40, %v1938_v42 }
 0xa40   :  { %v1945_v46 = vmul.f32 %v3904_v40, %v1937_v43 }
 0xa41   :  { %v5101_v48 = vadd.f32 %v3905_v44, %v1946_v45 }
 0xa42   :  { %v5099_v47 = vadd.f32 %v3905_v44, %v1945_v46 }
 0xa44   :  { %4242 = vmatprep.mubr.msk.f32.mxu1 %vm91_vm0, %v5099_v47 }
 0xa45   :  { %4243 = vmatmul.mubr.msk.f32.vlgmr.msra.gmra.mrb[22].mxu1 %vm91_vm0, %v5101_v48 }
 0xa46   :  { %4247 = vmatprep.mubr.msk.f32.mxu1 %vm4631_vm1, %v4630_v8 }
 0xb18   :  { %v4244_v51 = vpop.f32.mrb[22].mxu1 }
 0xb19   :  { %v2040_v52 = vpop.f32.mrb[23].mxu1  ;;  %v5126_v54 = vadd.f32 %v4244_v51, %v3911_v49 }
 0xb1a   :  { %v5112_v53 = vadd.f32 %v3911_v49, %v2040_v52 }
 0xb1c   :  { %2221 = vrot.lane.b32.xlu0 %v5112_v53, %s4635_s0  ;;  %2051 = vrot.lane.b32.xlu1 %v5112_v53, %s4633_s26 }
 0xb20   :  { %2393 = vrot.lane.b32.xlu0 %v5112_v53, %s4637_s30  ;;  %2219 = vrot.lane.b32.xlu1 %v5112_v53, %s4632_s25 }
 0xb24   :  { %2567 = vrot.lane.b32.xlu0 %v5112_v53, %s4638_s16  ;;  %2395 = vrot.lane.b32.xlu1 %v5112_v53, %s4634_s27 }
 0xb28   :  { %2913 = vrot.lane.b32.xlu0 %v5126_v54, %s4635_s0  ;;  %2569 = vrot.lane.b32.xlu1 %v5112_v53, %s5450_s3  ;;  %s5452_s0 = smov 56  }
 0xb2c   :  { %3087 = vrot.lane.b32.xlu0 %v5126_v54, %s4634_s27  ;;  %2743 = vrot.lane.b32.xlu1 %v5126_v54, %s4633_s26  ;;  %s5454_s26 = smov 48  }
 0xb30   :  { %3261 = vrot.lane.b32.xlu0 %v5126_v54, %s5450_s3  ;;  %2911 = vrot.lane.b32.xlu1 %v5126_v54, %s4632_s25  ;;  %s5453_s25 = smov 40  }
 0xb34   :  { %2142 = vrot.lane.b32.xlu0 %v5112_v53, %s5451_s24  ;;  %3085 = vrot.lane.b32.xlu1 %v5126_v54, %s4637_s30 }
 0xb38   :  { %3259 = vrot.lane.b32.xlu1 %v5126_v54, %s4638_s16 }
 0xb3c   :  { %2312 = vrot.lane.b32.xlu1 %v5112_v53, %s5452_s0 }
 0xb8e   :  { %v2222_v55 = vpop.permute.xlu0 %2221  ;;  %v2052_v56 = vpop.permute.xlu1 %2051 }
 0xb8f   :  { %4246 = vmatpush3.xpose.msk.msra.mxu1 %vm177_vm2, %v2052_v56  ;;  %4256 = vmatpush3.xpose.msk.msra.mxu0 %vm177_vm2, %v2222_v55 }
 0xb90   :  { %4265 = vmatprep.subr.mxu0 %v4630_v8  ;;  %4250 = vmatprep.subr.mxu1 %v4630_v8 }
 0xb92   :  { %v2394_v57 = vpop.permute.xlu0 %2393  ;;  %4248 = vmatmul.mubr.msk.f32.vlgmr.msra.gmra.mrb[24].mxu1 %vm177_vm2, %v5112_v53  ;;  %v2220_v58 = vpop.permute.xlu1 %2219 }
 0xb93   :  { %4258 = vmatmul.mubr.msk.f32.vlgmr.msra.gmra.mrb[18].mxu0 %vm177_vm2, %v2220_v58  ;;  %4252 = vmatprep.mubr.msk.f32.mxu1 %vm4631_vm1, %v4630_v8 }
 0xb94   :  { %4267 = vmatprep.mubr.msk.f32.mxu0 %vm4631_vm1, %v4630_v8 }
 0xb96   :  { %v2568_v59 = vpop.permute.xlu0 %2567  ;;  %v2396_v60 = vpop.permute.xlu1 %2395 }
 0xb97   :  { %4266 = vmatpush3.xpose.msk.msra.mxu0 %vm177_vm2, %v2396_v60 }
 0xb98   :  { %4275 = vmatprep.subr.mxu0 %v4630_v8 }
 0xb9a   :  { %v2914_v61 = vpop.permute.xlu0 %2913  ;;  %4268 = vmatmul.mubr.msk.f32.vlgmr.msra.gmra.mrb[20].mxu0 %vm177_vm2, %v2394_v57  ;;  %v2570_v13 = vpop.permute.xlu1 %2569 }
 0xb9b   :  { %4276 = vmatpush3.xpose.msk.msra.mxu0 %vm177_vm2, %v2570_v13  ;;  %4277 = vmatprep.mubr.msk.f32.mxu0 %vm4631_vm1, %v4630_v8 }
 0xb9c   :  { %4285 = vmatprep.subr.mxu0 %v4630_v8 }
 0xb9e   :  { %v3088_v62 = vpop.permute.xlu0 %3087  ;;  %4278 = vmatmul.mubr.msk.f32.vlgmr.msra.gmra.mrb[22].mxu0 %vm177_vm2, %v2568_v59  ;;  %v2744_v63 = vpop.permute.xlu1 %2743 }
 0xb9f   :  { %4286 = vmatpush3.xpose.msk.msra.mxu0 %vm177_vm2, %v2744_v63  ;;  %4287 = vmatprep.mubr.msk.f32.mxu0 %vm4631_vm1, %v4630_v8 }
 0xba0   :  { %4295 = vmatprep.subr.mxu0 %v4630_v8 }
 0xba2   :  { %v3262_v0 = vpop.permute.xlu0 %3261  ;;  %4288 = vmatmul.mubr.msk.f32.vlgmr.msra.gmra.mrb[24].mxu0 %vm177_vm2, %v5126_v54  ;;  %v2912_v1 = vpop.permute.xlu1 %2911 }
 0xba3   :  { %4296 = vmatpush3.xpose.msk.msra.mxu0 %vm177_vm2, %v2914_v61  ;;  %4297 = vmatprep.mubr.msk.f32.mxu0 %vm4631_vm1, %v4630_v8 }
 0xba4   :  { %4305 = vmatprep.subr.mxu0 %v4630_v8 }
 0xba6   :  { %v2143_v2 = vpop.permute.xlu0 %2142  ;;  %4298 = vmatmul.mubr.msk.f32.vlgmr.msra.gmra.mrb[26].mxu0 %vm177_vm2, %v2912_v1  ;;  %v3086_v3 = vpop.permute.xlu1 %3085 }
 0xba7   :  { %4251 = vmatpush3.msra.mxu1 %v2143_v2  ;;  %4306 = vmatpush3.xpose.msk.msra.mxu0 %vm177_vm2, %v3088_v62 }
 0xba8   :  { %4307 = vmatprep.mubr.msk.f32.mxu0 %vm4631_vm1, %v4630_v8  ;;  %4315 = vmatprep.subr.mxu0 %v4630_v8 }
 0xba9   :  { %4260 = vmatprep.subr.mxu1 %v4630_v8 }
 0xbaa   :  { %4308 = vmatmul.mubr.msk.f32.vlgmr.msra.gmra.mrb[28].mxu0 %vm177_vm2, %v3086_v3  ;;  %v3260_v4 = vpop.permute.xlu1 %3259 }
 0xbab   :  { %4316 = vmatpush3.xpose.msk.msra.mxu0 %vm177_vm2, %v3262_v0  ;;  %4317 = vmatprep.mubr.msk.f32.mxu0 %vm4631_vm1, %v4630_v8 }
 0xbae   :  { %4318 = vmatmul.mubr.msk.f32.vlgmr.msra.gmra.mrb[30].mxu0 %vm177_vm2, %v3260_v4  ;;  %v5208_v49 = vpop.permute.xlu1 %2312 }
 0xc65   :  { %v2123_v6 = vpop.f32.mrb[24].mxu1 }
 0xc66   :  { %v2127_v9 = vmul.f32 0.35355338, %v2123_v6  ;;  %v4249_v10 = vpop.f32.mrb[25].mxu1  ;;  %v2293_v7 = vpop.f32.mrb[18].mxu0 }
 0xc67   :  { %v2297_v5 = vmul.f32 0.35355338, %v2293_v7  ;;  %v4259_v11 = vpop.f32.mrb[19].mxu0 }
 0xc68   :  { %v2128_v14 = vadd.f32 %v2127_v9, %v4861_v30 }
 0xc69   :  { %v2298_v15 = vadd.f32 %v2297_v5, %v4861_v30 }
 0xc6a   :  { %v2129_v16 = vsel %vm177_vm2, %v2128_v14, -inf }
 0xc6b   :  { %2130 = vmax.xlane.f32.xlu0 %v2129_v16  ;;  %v2299_v17 = vsel %vm177_vm2, %v2298_v15, -inf }
 0xc6c   :  { %2300 = vmax.xlane.f32.xlu1 %v2299_v17 }
 0xc6d   :  { %v2467_v18 = vpop.f32.mrb[20].mxu0 }
 0xc6e   :  { %v2471_v19 = vmul.f32 0.35355338, %v2467_v18  ;;  %v4269_v20 = vpop.f32.mrb[21].mxu0 }
 0xc70   :  { %v2472_v21 = vadd.f32 %v2471_v19, %v4861_v30 }
 0xc71   :  { %v2641_v22 = vpop.f32.mrb[22].mxu0 }
 0xc72   :  { %v2645_v23 = vmul.f32 0.35355338, %v2641_v22  ;;  %v4279_v24 = vpop.f32.mrb[23].mxu0  ;;  %v2473_v25 = vsel %vm177_vm2, %v2472_v21, -inf }
 0xc73   :  { %2474 = vmax.xlane.f32.xlu0 %v2473_v25 }
 0xc74   :  { %v2646_v12 = vadd.f32 %v2645_v23, %v4861_v30 }
 0xc75   :  { %v2815_v26 = vpop.f32.mrb[24].mxu0 }
 0xc76   :  { %v2819_v27 = vmul.f32 0.35355338, %v2815_v26  ;;  %v4289_v28 = vpop.f32.mrb[25].mxu0  ;;  %v2647_v29 = vsel %vm177_vm2, %v2646_v12, -inf }
 0xc77   :  { %2648 = vmax.xlane.f32.xlu0 %v2647_v29 }
 0xc78   :  { %v2820_v31 = vadd.f32 %v2819_v27, %v4870_v50 }
 0xc79   :  { %v2985_v32 = vpop.f32.mrb[26].mxu0 }
 0xc7a   :  { %v2989_v33 = vmul.f32 0.35355338, %v2985_v32  ;;  %v4299_v34 = vpop.f32.mrb[27].mxu0  ;;  %v2821_v35 = vsel %vm177_vm2, %v2820_v31, -inf }
 0xc7b   :  { %2822 = vmax.xlane.f32.xlu1 %v2821_v35 }
 0xc7c   :  { %v2990_v36 = vadd.f32 %v2989_v33, %v4870_v50 }
 0xc7d   :  { %v3159_v37 = vpop.f32.mrb[28].mxu0 }
 0xc7e   :  { %v3163_v38 = vmul.f32 0.35355338, %v3159_v37  ;;  %v4309_v39 = vpop.f32.mrb[29].mxu0  ;;  %v2991_v30 = vsel %vm177_vm2, %v2990_v36, -inf }
 0xc7f   :  { %2992 = vmax.xlane.f32.xlu0 %v2991_v30 }
 0xc80   :  { %v3164_v40 = vadd.f32 %v3163_v38, %v4870_v50 }
 0xc81   :  { %v3333_v41 = vpop.f32.mrb[30].mxu0 }
 0xc82   :  { %v3337_v42 = vmul.f32 0.35355338, %v3333_v41  ;;  %v4319_v43 = vpop.f32.mrb[31].mxu0  ;;  %v3165_v44 = vsel %vm177_vm2, %v3164_v40, -inf }
 0xc83   :  { %3166 = vmax.xlane.f32.xlu1 %v3165_v44 }
 0xc84   :  { %v3338_v45 = vadd.f32 %v3337_v42, %v4870_v50 }
 0xc86   :  { %v3339_v46 = vsel %vm177_vm2, %v3338_v45, -inf }
 0xc87   :  { %3340 = vmax.xlane.f32.xlu0 %v3339_v46 }
 0xc94   :  { %2660 = vrot.lane.b32.xlu1 %v5112_v53, %s5453_s25 }
 0xc9d   :  { %2486 = vrot.lane.b32.xlu0 %v5112_v53, %s5454_s26 }
 0xcf8   :  { %v2131_v51 = vpop.xlane.xlu0 %2130 }
 0xcf9   :  { %v2132_v52 = vsub.f32 %v2128_v14, %v2131_v51  ;;  %v2301_v55 = vpop.xlane.xlu1 %2300 }
 0xcfa   :  { %v2302_v56 = vsub.f32 %v2298_v15, %v2301_v55 }
 0xcfb   :  { %v2133_v57 = vmul.f32 1.442695, %v2132_v52 }
 0xcfc   :  { %v2303_v58 = vmul.f32 1.442695, %v2302_v56 }
 0xcfd   :  { %4510 = vpow2.f32 %v2133_v57 }
 0xcfe   :  { %4512 = vpow2.f32 %v2303_v58 }
 0xd00   :  { %v2475_v50 = vpop.xlane.xlu0 %2474 }
 0xd01   :  { %v2476_v59 = vsub.f32 %v2472_v21, %v2475_v50 }
 0xd03   :  { %v2477_v60 = vmul.f32 1.442695, %v2476_v59 }
 0xd04   :  { %v2649_v61 = vpop.xlane.xlu0 %2648 }
 0xd05   :  { %4514 = vpow2.f32 %v2477_v60  ;;  %v2650_v13 = vsub.f32 %v2646_v12, %v2649_v61 }
 0xd07   :  { %v4511_v62 = vpop.eup %4510  ;;  %v2651_v63 = vmul.f32 1.442695, %v2650_v13 }
 0xd08   :  { %v4513_v0 = vpop.eup %4512  ;;  %v2135_v53 = vsel %vm177_vm2, %v4511_v62, 0.0  ;;  %v2823_v9 = vpop.xlane.xlu1 %2822 }
 0xd09   :  { %4516 = vpow2.f32 %v2651_v63  ;;  %2136 = vadd.xlane.f32.xlu1 %v2135_v53  ;;  %v2305_v1 = vsel %vm177_vm2, %v4513_v0, 0.0  ;;  %v2824_v10 = vsub.f32 %v2820_v31, %v2823_v9  ;;  %v3948_v9 = vld [vmem:[%s5427_s4 + $0x30] sm:$0xff] }
 0xd0a   :  { %2306 = vadd.xlane.f32.xlu0 %v2305_v1 }
 0xd0b   :  { %v2825_v14 = vmul.f32 1.442695, %v2824_v10  ;;  %v3949_v10 = vld [vmem:[%s5427_s4 + $0x38] sm:$0xff] }
 0xd0c   :  { %v2993_v7 = vpop.xlane.xlu0 %2992 }
 0xd0d   :  { %v2994_v11 = vsub.f32 %v2990_v36, %v2993_v7  ;;  %4518 = vpow2.f32 %v2825_v14 }
 0xd0f   :  { %v4515_v2 = vpop.eup %4514  ;;  %v2995_v17 = vmul.f32 1.442695, %v2994_v11 }
 0xd10   :  { %v2479_v3 = vsel %vm177_vm2, %v4515_v2, 0.0  ;;  %v3167_v5 = vpop.xlane.xlu1 %3166 }
 0xd11   :  { %2480 = vadd.xlane.f32.xlu1 %v2479_v3  ;;  %v3168_v15 = vsub.f32 %v3164_v40, %v3167_v5  ;;  %4520 = vpow2.f32 %v2995_v17  ;;  %v3947_v3 = vld [vmem:[%s5427_s4 + $0x28] sm:$0xff]  ;;  %v4418_v5 = vpack.c.bf16 %v3949_v10, %v3948_v9  ;;  %v3970_v10 = vld [vmem:[%s5433_s10 + $0x60] sm:$0xff] }
 0xd13   :  { %v5213_v4 = vpop.eup %4516  ;;  %v3169_v18 = vmul.f32 1.442695, %v3168_v15 }
 0xd14   :  { %v2653_v6 = vsel %vm177_vm2, %v5213_v4, 0.0  ;;  %v3341_v16 = vpop.xlane.xlu0 %3340  ;;  %v2661_v28 = vpop.permute.xlu1 %2660 }
 0xd15   :  { %2654 = vadd.xlane.f32.xlu0 %v2653_v6  ;;  %v3342_v19 = vsub.f32 %v3338_v45, %v3341_v16  ;;  %4522 = vpow2.f32 %v3169_v18 }
 0xd17   :  { %v3343_v20 = vmul.f32 1.442695, %v3342_v19  ;;  %v5221_v21 = vpop.eup %4518 }
 0xd18   :  { %v2827_v23 = vsel %vm177_vm2, %v5221_v21, 0.0  ;;  %v2487_v29 = vpop.permute.xlu0 %2486 }
 0xd19   :  { %4524 = vpow2.f32 %v3343_v20 }
 0xd1b   :  { %v5223_v22 = vpop.eup %4520 }
 0xd1c   :  { %v2997_v25 = vsel %vm177_vm2, %v5223_v22, 0.0 }
 0xd1f   :  { %v5227_v24 = vpop.eup %4522 }
 0xd20   :  { %v3171_v12 = vsel %vm177_vm2, %v5227_v24, 0.0 }
 0xd22   :  { %3004 = vrot.lane.b32.xlu1 %v5126_v54, %s5452_s0 }
 0xd23   :  { %v5233_v26 = vpop.eup %4524 }
 0xd24   :  { %v3345_v27 = vsel %vm177_vm2, %v5233_v26, 0.0 }
 0xd2b   :  { %2834 = vrot.lane.b32.xlu0 %v5126_v54, %s5451_s24 }
 0xd46   :  { %2828 = vadd.xlane.f32.xlu1 %v2827_v23 }
 0xd4a   :  { %2998 = vadd.xlane.f32.xlu0 %v2997_v25  ;;  %3172 = vadd.xlane.f32.xlu1 %v3171_v12 }
 0xd4e   :  { %3346 = vadd.xlane.f32.xlu1 %v3345_v27 }
 0xd5f   :  { %3352 = vrot.lane.b32.xlu1 %v5126_v54, %s5453_s25  ;;  %s4645_s25 = smov [#allocation8]  }
 0xd60   :  { %3178 = vrot.lane.b32.xlu0 %v5126_v54, %s5454_s26  ;;  %s3842_s26 = sshll.u32 %s4645_s25, 4  ;;  %s3843_s26 = int_to_ptr.vmem [resolvable:$true] %s3842_s26 }
 0xd61   :  { %p4603_p3 = scmp.lt.s32.totalorder %s3843_s26, %s3843_s26 }
 0xd96   :  { %v2137_v31 = vpop.xlane.xlu1 %2136 }
 0xd97   :  { %4526 = vrcp.f32 %v2137_v31  ;;  %v2307_v32 = vpop.xlane.xlu0 %2306 }
 0xd98   :  { %4528 = vrcp.f32 %v2307_v32 }
 0xd9e   :  { %v2481_v33 = vpop.xlane.xlu1 %2480 }
 0xd9f   :  { %4530 = vrcp.f32 %v2481_v33 }
 0xda1   :  { %v4527_v34 = vpop.eup %4526 }
 0xda2   :  { %v4529_v35 = vpop.eup %4528  ;;  %v2139_v36 = vmul.f32 %v4527_v34, %v4511_v62  ;;  %v2655_v37 = vpop.xlane.xlu0 %2654 }
 0xda3   :  { %v2309_v38 = vmul.f32 %v4529_v35, %v4513_v0  ;;  %4532 = vrcp.f32 %v2655_v37  ;;  %v3005_v42 = vpop.permute.xlu1 %3004 }
 0xda4   :  { %3916 = vst.msk [vmem:[%s5438_s15 + $0x40] sm:$0xff] %vm177_vm2, %v2139_v36  ;;  %4253 = vmatmul.mubr.msk.f32.vlgmr.msra.gmra.mrb[26].mxu1 %vm177_vm2, %v2139_v36 }
 0xda5   :  { %3920 = vst.msk [vmem:[%s5438_s15 + $0x48] sm:$0xff] %vm177_vm2, %v2309_v38  ;;  %4261 = vmatpush3.msra.mxu1 %v5208_v49  ;;  %4262 = vmatprep.mubr.msk.f32.mxu1 %vm4631_vm1, %v4630_v8 }
 0xda6   :  { %4270 = vmatprep.subr.mxu1 %v4630_v8  ;;  %v2835_v41 = vpop.permute.xlu0 %2834 }
 0xda8   :  { %4263 = vmatmul.mubr.msk.f32.vlgmr.msra.gmra.mrb[28].mxu1 %vm177_vm2, %v2309_v38 }
 0xda9   :  { %v4531_v54 = vpop.eup %4530  ;;  %4271 = vmatpush3.msra.mxu1 %v2487_v29  ;;  %4272 = vmatprep.mubr.msk.f32.mxu1 %vm4631_vm1, %v4630_v8 }
 0xdaa   :  { %v2483_v39 = vmul.f32 %v4531_v54, %v4515_v2  ;;  %4280 = vmatprep.subr.mxu1 %v4630_v8 }
 0xdac   :  { %3924 = vst.msk [vmem:[%s5438_s15 + $0x50] sm:$0xff] %vm177_vm2, %v2483_v39  ;;  %4273 = vmatmul.mubr.msk.f32.vlgmr.msra.gmra.mrb[30].mxu1 %vm177_vm2, %v2483_v39 }
 0xdad   :  { %v4533_v30 = vpop.eup %4532  ;;  %4281 = vmatpush3.msra.mxu1 %v2661_v28  ;;  %4282 = vmatprep.mubr.msk.f32.mxu1 %vm4631_vm1, %v4630_v8 }
 0xdae   :  { %v2657_v40 = vmul.f32 %v4533_v30, %v5213_v4  ;;  %4290 = vmatprep.subr.mxu1 %v4630_v8 }
 0xdb0   :  { %3928 = vst.msk [vmem:[%s5438_s15 + $0x58] sm:$0xff] %vm177_vm2, %v2657_v40  ;;  %4283 = vmatmul.mubr.msk.f32.vlgmr.msra.gmra.mrb[32].mxu1 %vm177_vm2, %v2657_v40 }
 0xdb1   :  { %4291 = vmatpush3.msra.mxu1 %v2835_v41  ;;  %4292 = vmatprep.mubr.msk.f32.mxu1 %vm4631_vm1, %v4630_v8 }
 0xdb2   :  { %4300 = vmatprep.subr.mxu1 %v4630_v8 }
 0xdd3   :  { %v2829_v43 = vpop.xlane.xlu1 %2828 }
 0xdd4   :  { %4534 = vrcp.f32 %v2829_v43  ;;  %v3959_v43 = vld [vmem:[%s5431_s8 + $0x28] sm:$0xff] }
 0xdd7   :  { %v2999_v44 = vpop.xlane.xlu0 %2998  ;;  %v3173_v45 = vpop.xlane.xlu1 %3172 }
 0xdd8   :  { %4536 = vrcp.f32 %v2999_v44 }
 0xdd9   :  { %4538 = vrcp.f32 %v3173_v45  ;;  %v3960_v45 = vld [vmem:[%s5431_s8 + $0x30] sm:$0xff] }
 0xddb   :  { %v3347_v46 = vpop.xlane.xlu1 %3346  ;;  %v3179_v58 = vpop.permute.xlu0 %3178 }
 0xddc   :  { %4540 = vrcp.f32 %v3347_v46  ;;  %v3961_v46 = vld [vmem:[%s5431_s8 + $0x38] sm:$0xff] }
 0xdde   :  { %v4535_v49 = vpop.eup %4534 }
 0xddf   :  { %v2831_v51 = vmul.f32 %v4535_v49, %v5221_v21  ;;  %v3353_v60 = vpop.permute.xlu1 %3352  ;;  %v4426_v49 = vpack.c.bf16 %v3961_v46, %v3960_v45 }
 0xde1   :  { %3932 = vst.msk [vmem:[%s5438_s15 + $0x60] sm:$0xff] %vm177_vm2, %v2831_v51  ;;  %4293 = vmatmul.mubr.msk.f32.vlgmr.msra.gmra.mrb[34].mxu1 %vm177_vm2, %v2831_v51 }
 0xde2   :  { %v4537_v52 = vpop.eup %4536  ;;  %4301 = vmatpush3.msra.mxu1 %v3005_v42  ;;  %4302 = vmatprep.mubr.msk.f32.mxu1 %vm4631_vm1, %v4630_v8 }
 0xde3   :  { %v4539_v55 = vpop.eup %4538  ;;  %v3001_v56 = vmul.f32 %v4537_v52, %v5223_v22  ;;  %4310 = vmatprep.subr.mxu1 %v4630_v8 }
 0xde4   :  { %v3175_v57 = vmul.f32 %v4539_v55, %v5227_v24 }
 0xde5   :  { %3936 = vst.msk [vmem:[%s5438_s15 + $0x68] sm:$0xff] %vm177_vm2, %v3001_v56  ;;  %4303 = vmatmul.mubr.msk.f32.vlgmr.msra.gmra.mrb[36].mxu1 %vm177_vm2, %v3001_v56 }
 0xde6   :  { %v4541_v50 = vpop.eup %4540  ;;  %3940 = vst.msk [vmem:[%s5438_s15 + $0x70] sm:$0xff] %vm177_vm2, %v3175_v57  ;;  %4311 = vmatpush3.msra.mxu1 %v3179_v58  ;;  %4312 = vmatprep.mubr.msk.f32.mxu1 %vm4631_vm1, %v4630_v8 }
 0xde7   :  { %v3349_v59 = vmul.f32 %v4541_v50, %v5233_v26  ;;  %4320 = vmatprep.subr.mxu1 %v4630_v8  ;;  %v3951_v26 = vld [vmem:[%s5428_s5 + $0x1] ss:$0 sm:$0xff] }
 0xde9   :  { %3944 = vst.msk [vmem:[%s5438_s15 + $0x78] sm:$0xff] %vm177_vm2, %v3349_v59  ;;  %4313 = vmatmul.mubr.msk.f32.vlgmr.msra.gmra.mrb[38].mxu1 %vm177_vm2, %v3175_v57  ;;  %s4598_s15 = scalar_lea.vmem %s3843_s26, 256 }
 0xdea   :  { %4321 = vmatpush3.msra.mxu1 %v3353_v60  ;;  %4322 = vmatprep.mubr.msk.f32.mxu1 %vm4631_vm1, %v4630_v8  ;;  %v3946_v8 = vld [vmem:[%s5427_s4 + $0x20] sm:$0xff]  ;;  %p4599_p2 = scmp.ne.s32.totalorder %s3843_s26, %s4598_s15  ;;  %p4604_p4 = scmp.lt.s32.totalorder %s4598_s15, %s4598_s15 }
 0xdeb   :  { %v4414_v4 = vpack.c.bf16 %v3947_v3, %v3946_v8  ;;  %v3967_v8 = vld [vmem:[%s5433_s10 + $0x48] sm:$0xff] }
 0xdec   :  { %p4605_p5 = por %p4604_p4, %p4603_p3 }
 0xded   :  { %4323 = vmatmul.mubr.msk.f32.vlgmr.msra.gmra.mrb[40].mxu1 %vm177_vm2, %v3349_v59  ;;  %4415 = vmatprep.subr.bf16.mxu0 %v4414_v4  ;;  %v3956_v59 = vld [vmem:[%s5429_s6 + $0x1] ss:$0 sm:$0xff] }
 0xdee   :  { %4417 = vmatpush3.bf16.msra.mxu0 %v4414_v4  ;;  %v3968_v4 = vld [vmem:[%s5433_s10 + $0x50] sm:$0xff]  ;;  %p4606_p6 = pnand %p4605_p5, %p4599_p2 }
 0xdef   :  { %4419 = vmatprep.subr.bf16.mxu0 %v4418_v5 }
 0xdf2   :  { %4421 = vmatpush3.bf16.msra.mxu0 %v4418_v5 }
 0xe77   :  { %v2214_v61 = vpop.f32.mrb[26].mxu1 }
 0xe78   :  { %2218 = vst.msk [vmem:[#allocation2] sm:$0xff] %vm177_vm2, %v2214_v61  ;;  %v4254_v13 = vpop.f32.mrb[27].mxu1  ;;  %v3957_v61 = vld [vmem:[%s5430_s7 + $0x1] ss:$0 sm:$0xff] }
 0xe7b   :  { %v2384_v62 = vpop.f32.mrb[28].mxu1 }
 0xe7c   :  { %2389 = vrot.lane.b32.xlu0 %v2384_v62, %s4628_s29  ;;  %v4264_v63 = vpop.f32.mrb[29].mxu1 }
 0xe7f   :  { %v2558_v0 = vpop.f32.mrb[30].mxu1 }
 0xe80   :  { %2563 = vrot.lane.b32.xlu1 %v2558_v0, %s4643_s23  ;;  %v4274_v53 = vpop.f32.mrb[31].mxu1 }
 0xe83   :  { %v2732_v1 = vpop.f32.mrb[32].mxu1 }
 0xe84   :  { %2737 = vrot.lane.b32.xlu1 %v2732_v1, %s4644_s1  ;;  %v4284_v2 = vpop.f32.mrb[33].mxu1 }
 0xe85   :  { %v3966_v2 = vld [vmem:[%s5433_s10 + $0x40] sm:$0xff] }
 0xe86   :  { %v4430_v3 = vpack.c.bf16 %v3967_v8, %v3966_v2  ;;  %v3981_v8 = vld [vmem:[%s5436_s13 + $0x1] ss:$0 sm:$0xff] }
 0xe88   :  { %4431 = vmatprep.subr.bf16.mxu0 %v4430_v3 }
 0xeb4   :  { %v2906_v6 = vpop.f32.mrb[34].mxu1 }
 0xeb5   :  { %2910 = vst.msk [vmem:[#allocation2 + $0x8] sm:$0xff] %vm177_vm2, %v2906_v6  ;;  %v4294_v7 = vpop.f32.mrb[35].mxu1  ;;  %v3969_v6 = vld [vmem:[%s5433_s10 + $0x58] sm:$0xff] }
 0xeb6   :  { %v4434_v9 = vpack.c.bf16 %v3969_v6, %v3968_v4  ;;  %v3971_v7 = vld [vmem:[%s5433_s10 + $0x68] sm:$0xff] }
 0xeb7   :  { %v4438_v5 = vpack.c.bf16 %v3971_v7, %v3970_v10 }
 0xeb8   :  { %v3076_v11 = vpop.f32.mrb[36].mxu1 }
 0xeb9   :  { %3081 = vrot.lane.b32.xlu0 %v3076_v11, %s4628_s29  ;;  %v4304_v14 = vpop.f32.mrb[37].mxu1  ;;  %v3972_v11 = vld [vmem:[%s5433_s10 + $0x70] sm:$0xff] }
 0xeba   :  { %v3973_v14 = vld [vmem:[%s5433_s10 + $0x78] sm:$0xff] }
 0xebc   :  { %v3250_v15 = vpop.f32.mrb[38].mxu1 }
 0xebd   :  { %3255 = vrot.lane.b32.xlu0 %v3250_v15, %s4643_s23  ;;  %v4314_v16 = vpop.f32.mrb[39].mxu1  ;;  %v4442_v15 = vpack.c.bf16 %v3973_v14, %v3972_v11 }
 0xebe   :  { %v3963_v16 = vld [vmem:[%s5432_s9 + $0x1] ss:$0 sm:$0xff] }
 0xec0   :  { %v3424_v17 = vpop.f32.mrb[40].mxu1 }
 0xec1   :  { %3429 = vrot.lane.b32.xlu1 %v3424_v17, %s4644_s1  ;;  %v4324_v18 = vpop.f32.mrb[41].mxu1 }
 0xeee   :  { %v2390_v19 = vpop.permute.xlu0 %2389 }
 0xeef   :  { %2392 = vst.msk [vmem:[#allocation2] sm:$0xff] %vm516_vm3, %v2390_v19 }
 0xef2   :  { %v2564_v20 = vpop.permute.xlu1 %2563 }
 0xef3   :  { %2566 = vst.msk [vmem:[#allocation2] sm:$0xff] %vm691_vm4, %v2564_v20 }
 0xef6   :  { %v2738_v21 = vpop.permute.xlu1 %2737 }
 0xef7   :  { %2740 = vst.msk [vmem:[#allocation2] sm:$0xff] %vm866_vm5, %v2738_v21 }
 0xefe   :  { %v3433_v22 = vld [vmem:[#allocation2] sm:$0xff] }
 0xeff   :  { %4333 = vmatprep.mubr.msk.f32.mxu0 %vm91_vm0, %v3433_v22 }
 0xf2b   :  { %v3082_v23 = vpop.permute.xlu0 %3081 }
 0xf2c   :  { %3084 = vst.msk [vmem:[#allocation2 + $0x8] sm:$0xff] %vm516_vm3, %v3082_v23 }
 0xf2f   :  { %v3256_v24 = vpop.permute.xlu0 %3255 }
 0xf30   :  { %3258 = vst.msk [vmem:[#allocation2 + $0x8] sm:$0xff] %vm691_vm4, %v3256_v24 }
 0xf33   :  { %v3430_v25 = vpop.permute.xlu1 %3429 }
 0xf34   :  { %3432 = vst.msk [vmem:[#allocation2 + $0x8] sm:$0xff] %vm866_vm5, %v3430_v25 }
 0xf3b   :  { %v3434_v12 = vld [vmem:[#allocation2 + $0x8] sm:$0xff] }
 0xf3c   :  { %4334 = vmatmul.mubr.msk.f32.vlgmr.msra.gmra.mrb[32].mxu0 %vm91_vm0, %v3434_v12 }
 0xf3d   :  { %4433 = vmatpush3.bf16.msra.mxu0 %v4430_v3 }
 0xf3e   :  { %4435 = vmatprep.subr.bf16.mxu0 %v4434_v9 }
 0xf41   :  { %4437 = vmatpush3.bf16.msra.mxu0 %v4434_v9 }
 0xf42   :  { %4439 = vmatprep.subr.bf16.mxu0 %v4438_v5 }
 0xf45   :  { %4441 = vmatpush3.bf16.msra.mxu0 %v4438_v5 }
 0xf46   :  { %4443 = vmatprep.subr.bf16.mxu0 %v4442_v15 }
 0xf49   :  { %4445 = vmatpush3.bf16.msra.mxu0 %v4442_v15 }
0x100f   :  { %v4335_v27 = vpop.f32.mrb[32].mxu0 }
0x1010   :  { %v3526_v28 = vadd.f32 %v4335_v27, %v3951_v26  ;;  %v3520_v29 = vpop.f32.mrb[33].mxu0 }
0x1011   :  { %v3521_v31 = vadd.f32 %v3951_v26, %v3520_v29 }
0x1012   :  { %v3530_v32 = vadd.f32 %v3526_v28, %v5101_v48 }
0x1013   :  { %v3529_v33 = vadd.f32 %v3521_v31, %v5099_v47  ;;  %v3958_v47 = vld [vmem:[%s5431_s8 + $0x20] sm:$0xff] }
0x1014   :  { %v3538_v34 = vsel %vm91_vm0, %v3530_v32, 0.0  ;;  %v4422_v44 = vpack.c.bf16 %v3959_v43, %v3958_v47 }
0x1015   :  { %3539 = vadd.xlane.f32.xlu1 %v3538_v34  ;;  %v3535_v35 = vsel %vm91_vm0, %v3529_v33, 0.0 }
0x1016   :  { %3536 = vadd.xlane.f32.xlu0 %v3535_v35  ;;  %4423 = vmatprep.subr.bf16.mxu1 %v4422_v44 }
0x1017   :  { %4425 = vmatpush3.bf16.msra.mxu1 %v4422_v44 }
0x1018   :  { %4427 = vmatprep.subr.bf16.mxu1 %v4426_v49 }
0x101b   :  { %4429 = vmatpush3.bf16.msra.mxu1 %v4426_v49 }
0x10a2   :  { %v3540_v36 = vpop.xlane.xlu1 %3539 }
0x10a3   :  { %v3542_v37 = vmul.f32 0.03125, %v3540_v36  ;;  %v3537_v38 = vpop.xlane.xlu0 %3536 }
0x10a4   :  { %v3541_v54 = vmul.f32 0.03125, %v3537_v38 }
0x10a5   :  { %v3544_v39 = vsub.f32 %v3530_v32, %v3542_v37 }
0x10a6   :  { %v3543_v30 = vsub.f32 %v3529_v33, %v3541_v54  ;;  %v3975_v54 = vld [vmem:[%s5434_s11 + $0x1] ss:$0 sm:$0xff] }
0x10a7   :  { %v3546_v42 = vmul.f32 %v3544_v39, %v3544_v39 }
0x10a8   :  { %v3545_v40 = vmul.f32 %v3543_v30, %v3543_v30 }
0x10a9   :  { %v3550_v48 = vsel %vm91_vm0, %v3546_v42, 0.0 }
0x10aa   :  { %v3547_v41 = vsel %vm91_vm0, %v3545_v40, 0.0 }
0x10ab   :  { %3548 = vadd.xlane.f32.xlu0 %v3547_v41 }
0x10af   :  { %3551 = vadd.xlane.f32.xlu0 %v3550_v48 }
0x1138   :  { %v3549_v51 = vpop.xlane.xlu0 %3548 }
0x1139   :  { %v3553_v52 = vmul.f32 0.03125, %v3549_v51 }
0x113b   :  { %v3555_v55 = vadd.f32 1e-06, %v3553_v52 }
0x113c   :  { %v3552_v56 = vpop.xlane.xlu0 %3551 }
0x113d   :  { %4542 = vrsqrt.f32 %v3555_v55  ;;  %v3554_v57 = vmul.f32 0.03125, %v3552_v56 }
0x113f   :  { %v3556_v58 = vadd.f32 1e-06, %v3554_v57 }
0x1141   :  { %4544 = vrsqrt.f32 %v3556_v58 }
0x1147   :  { %v4543_v50 = vpop.eup %4542 }
0x1148   :  { %v3559_v60 = vmul.f32 %v4543_v50, %v3543_v30 }
0x114a   :  { %v3567_v13 = vmul.f32 %v3956_v59, %v3559_v60 }
0x114b   :  { %v4545_v62 = vpop.eup %4544 }
0x114c   :  { %v3560_v63 = vmul.f32 %v4545_v62, %v3544_v39  ;;  %v3575_v0 = vadd.f32 %v3957_v61, %v3567_v13 }
0x114e   :  { %v3568_v53 = vmul.f32 %v3956_v59, %v3560_v63  ;;  %4344 = vmatprep.mubr.msk.f32.mxu1 %vm91_vm0, %v3575_v0 }
0x1150   :  { %v3576_v1 = vadd.f32 %v3957_v61, %v3568_v53 }
0x1152   :  { %4345 = vmatmul.mubr.msk.f32.vlgmr.msra.gmra.mrb[42].mxu1 %vm91_vm0, %v3576_v1 }
0x1225   :  { %v4346_v17 = vpop.f32.mrb[42].mxu1 }
0x1226   :  { %v3668_v18 = vadd.f32 %v4346_v17, %v3963_v16  ;;  %v3662_v19 = vpop.f32.mrb[43].mxu1 }
0x1227   :  { %v3663_v20 = vadd.f32 %v3963_v16, %v3662_v19 }
0x1228   :  { %v3672_v21 = vmul.f32 %v3668_v18, %v3668_v18 }
0x1229   :  { %v3671_v22 = vmul.f32 %v3663_v20, %v3663_v20 }
0x122a   :  { %v3674_v23 = vmul.f32 %v3672_v21, %v3668_v18 }
0x122b   :  { %v3673_v24 = vmul.f32 %v3671_v22, %v3663_v20 }
0x122c   :  { %v3676_v25 = vmul.f32 0.044715, %v3674_v23 }
0x122d   :  { %v3675_v12 = vmul.f32 0.044715, %v3673_v24 }
0x122e   :  { %v3678_v26 = vadd.f32 %v3676_v25, %v3668_v18 }
0x122f   :  { %v3677_v27 = vadd.f32 %v3675_v12, %v3663_v20 }
0x1230   :  { %v3680_v28 = vmul.f32 0.7978846, %v3678_v26 }
0x1231   :  { %v3679_v29 = vmul.f32 0.7978846, %v3677_v27 }
0x1232   :  { %4546 = vtanh.f32 %v3680_v28 }
0x1233   :  { %4548 = vtanh.f32 %v3679_v29 }
0x123c   :  { %v4547_v31 = vpop.eup %4546 }
0x123d   :  { %v4549_v32 = vpop.eup %4548  ;;  %v3684_v33 = vadd.f32 1.0, %v4547_v31 }
0x123e   :  { %v3683_v34 = vadd.f32 1.0, %v4549_v32 }
0x123f   :  { %v3686_v35 = vmul.f32 0.5, %v3684_v33 }
0x1240   :  { %v3685_v36 = vmul.f32 0.5, %v3683_v34 }
0x1241   :  { %v3688_v38 = vmul.f32 %v3686_v35, %v3668_v18 }
0x1242   :  { %v3687_v37 = vmul.f32 %v3685_v36, %v3663_v20 }
0x1244   :  { %4363 = vmatprep.mubr.msk.f32.mxu0 %vm1827_vm6, %v3687_v37 }
0x1245   :  { %4364 = vmatmul.mubr.msk.f32.vlgmr.msra.gmra.mrb[34].mxu0 %vm1827_vm6, %v3688_v38 }
0x1318   :  { %v4365_v39 = vpop.f32.mrb[34].mxu0 }
0x1319   :  { %v3784_v30 = vadd.f32 %v4365_v39, %v3975_v54  ;;  %v3778_v40 = vpop.f32.mrb[35].mxu0 }
0x131a   :  { %v3779_v41 = vadd.f32 %v3975_v54, %v3778_v40 }
0x131b   :  { %v3788_v42 = vadd.f32 %v3784_v30, %v3576_v1 }
0x131c   :  { %v3787_v48 = vadd.f32 %v3779_v41, %v3575_v0  ;;  %v3980_v0 = vld [vmem:[%s5435_s12 + $0x1] ss:$0 sm:$0xff] }
0x131d   :  { %v3796_v47 = vsel %vm91_vm0, %v3788_v42, 0.0 }
0x131e   :  { %3797 = vadd.xlane.f32.xlu0 %v3796_v47  ;;  %v3793_v43 = vsel %vm91_vm0, %v3787_v48, 0.0 }
0x131f   :  { %3794 = vadd.xlane.f32.xlu1 %v3793_v43 }
0x13ab   :  { %v3798_v44 = vpop.xlane.xlu0 %3797 }
0x13ac   :  { %v3800_v45 = vmul.f32 0.03125, %v3798_v44  ;;  %v3795_v46 = vpop.xlane.xlu1 %3794 }
0x13ad   :  { %v3799_v49 = vmul.f32 0.03125, %v3795_v46 }
0x13ae   :  { %v3802_v51 = vsub.f32 %v3788_v42, %v3800_v45 }
0x13af   :  { %v3801_v52 = vsub.f32 %v3787_v48, %v3799_v49 }
0x13b0   :  { %v3804_v55 = vmul.f32 %v3802_v51, %v3802_v51 }
0x13b1   :  { %v3803_v56 = vmul.f32 %v3801_v52, %v3801_v52 }
0x13b2   :  { %v3808_v57 = vsel %vm91_vm0, %v3804_v55, 0.0 }
0x13b3   :  { %3809 = vadd.xlane.f32.xlu0 %v3808_v57  ;;  %v3805_v58 = vsel %vm91_vm0, %v3803_v56, 0.0 }
0x13b4   :  { %3806 = vadd.xlane.f32.xlu1 %v3805_v58 }
0x1440   :  { %v3810_v50 = vpop.xlane.xlu0 %3809 }
0x1441   :  { %v3812_v59 = vmul.f32 0.03125, %v3810_v50  ;;  %v3807_v60 = vpop.xlane.xlu1 %3806 }
0x1442   :  { %v3811_v61 = vmul.f32 0.03125, %v3807_v60 }
0x1443   :  { %v3814_v13 = vadd.f32 1e-06, %v3812_v59 }
0x1444   :  { %v3813_v62 = vadd.f32 1e-06, %v3811_v61 }
0x1445   :  { %4550 = vrsqrt.f32 %v3814_v13 }
0x1446   :  { %4552 = vrsqrt.f32 %v3813_v62 }
0x144f   :  { %v4551_v63 = vpop.eup %4550 }
0x1450   :  { %v4553_v53 = vpop.eup %4552  ;;  %v3818_v1 = vmul.f32 %v4551_v63, %v3802_v51 }
0x1451   :  { %v3817_v2 = vmul.f32 %v4553_v53, %v3801_v52 }
0x1452   :  { %v3826_v3 = vmul.f32 %v3980_v0, %v3818_v1 }
0x1453   :  { %v3825_v4 = vmul.f32 %v3980_v0, %v3817_v2 }
0x1454   :  { %v3834_v6 = vadd.f32 %v3981_v8, %v3826_v3 }
0x1455   :  { %v3833_v9 = vadd.f32 %v3981_v8, %v3825_v4 }
0x1456   :  { %3836 = vst.msk [vmem:[#allocation8 + $0x8] sm:$0xff] %vm91_vm0, %v3834_v6 }
0x1457   :  { %3835 = vst.msk [vmem:[#allocation8] sm:$0xff] %vm91_vm0, %v3833_v9 }
0x1458   :  { %4609 = shalt.err (!%p4606_p6)
}
0x1459   :  { %s4610_s8 = scalar_lea.hbm %s5437_s14, 256 }
0x145a   :  { %p4611_p7 = scmp.ne.s32.totalorder %s5437_s14, %s4610_s8  ;;  %p4614_p8 = scmp.lt.u32.totalorder %s4610_s8, %s5437_s14 }
0x145c   :  { %p4616_p9 = pnand %p4614_p8, %p4611_p7 }
0x145e   :  { %4619 = shalt.err (!%p4616_p9)
}
0x145f   :  { %s5455_s16 = smov 128  }
0x1460   :  { %3848 = dma.vmem_to_hbm [thread:$0]  %s3843_s26, 256, %s5437_s14, [#allocation5], %s5455_s16, %s5455_s16, %s4628_s29  }
0x1461   :  { %4624 = dma.done.wait [#allocation5], 256  }
0x1462   :  { %4625 = vsyncadd [#allocation5], 4294967040 }
0x1463   :  { %3856 = vsyncpa [#allocation4], 1 }
0x1464   :  { %3857 = vsyncpa [#allocation7], 1 }
0x1465   :  { %3858 = vsyncpa [#allocation5], 1 }

</bundles_post_ra>
